<compile_context>
chip_gen: v6e
topology: v6e:2x2x1
jax: 0.10.0
libtpu: 0.0.40
codegen_flags: <defaults>
</compile_context>

<pallas_src>
import math
import functools

import jax
import jax.numpy as jnp
from jax.experimental import pallas as pl
from jax.experimental.pallas import tpu as pltpu


# Tile caps (review): big enough to amortize grid-step overhead and cut weight re-streaming,
# small enough to double-buffer comfortably inside v7x's 64 MiB VMEM.
TM_CAP, TN_CAP, TK_CAP = 512, 512, 1024   # linear matmul tiles
TQ_CAP, TKV_CAP = 256, 256                # attention q / kv tiles
TV_CAP = 2048                             # vocab tile for the scoring head
NEG_INF = -1e9


# ----------------------------------------------------------------------------
# small helpers
# ----------------------------------------------------------------------------

def _round_up(x, m):
    return ((x + m - 1) // m) * m


def _pick_tile(dim, cap):
    """(tile, padded_dim). Full dim if it fits one block (block == full dim is legal)."""
    if dim <= cap:
        return dim, dim
    return cap, _round_up(dim, cap)


def _seq_tile(s, cap):
    """Largest tile <= cap that divides s (multiple of 8), else s itself."""
    if s <= cap:
        return s
    for t in range(cap, 7, -8):
        if s % t == 0:
            return t
    return s


def _pad2d(x, rows, cols):
    r, c = x.shape
    if (r, c) == (rows, cols):
        return x
    return jnp.pad(x, ((0, rows - r), (0, cols - c)))


def _mosaic(semantics, block_bytes):
    """Footprint-derived vmem limit (+16 MiB compiler headroom), capped for v7x's 64 MiB."""
    limit = int(min(max(block_bytes + (16 << 20), 24 << 20), 48 << 20))
    return pltpu.CompilerParams(dimension_semantics=semantics, vmem_limit_bytes=limit)


_GELU_C = math.sqrt(2.0 / math.pi)


def _gelu_tanh(x):
    # tanh-form GELU: the transcendental lands on the EUP slot (frees the VALU in the
    # matmul finalize epilogue); indistinguishable from erf-GELU at bf16 precision.
    return 0.5 * x * (1.0 + jnp.tanh(_GELU_C * (x + 0.044715 * x * x * x)))


# ----------------------------------------------------------------------------
# Pallas kernels
# ----------------------------------------------------------------------------

def _linear_kernel(x_ref, w_ref, b_ref, o_ref, acc_ref, *, activation):
    k = pl.program_id(2)

    @pl.when(k == 0)
    def _():
        acc_ref[...] = jnp.zeros_like(acc_ref)

    acc_ref[...] += jnp.dot(x_ref[...], w_ref[...],
                            preferred_element_type=jnp.float32)

    @pl.when(k == pl.num_programs(2) - 1)
    def _():
        out = acc_ref[...] + b_ref[...]          # bias in f32
        if activation == 'gelu':
            out = _gelu_tanh(out)                # fused bias + GELU
        o_ref[...] = out.astype(o_ref.dtype)


def pallas_linear(x, w, b, activation=None, out_dtype=None):
    """x: (M, K), w: (K, N) bf16, b: (N,) f32 -> (M, N).
    Tiled/pipelined MXU matmul, bf16 operands, f32 accumulator in VMEM scratch."""
    M, K = x.shape
    N = w.shape[1]
    out_dtype = out_dtype or x.dtype

    tm, Mp = _pick_tile(M, TM_CAP)
    tn, Np = _pick_tile(N, TN_CAP)
    tk, Kp = _pick_tile(K, TK_CAP)

    # weights/biases are stored pre-cast (bf16 / f32) at load time -> casts are no-ops here
    xp = _pad2d(x.astype(jnp.bfloat16), Mp, Kp)          # zero K-padding is matmul-safe
    wp = _pad2d(w.astype(jnp.bfloat16), Kp, Np)
    bp = _pad2d(b.astype(jnp.float32).reshape(1, N), 1, Np)

    grid = (Mp // tm, Np // tn, Kp // tk)                # reduction axis last
    out_bytes = jnp.dtype(out_dtype).itemsize
    vmem = 2 * (tm * tk * 2 + tk * tn * 2 + tn * 4 + tm * tn * out_bytes) + tm * tn * 4

    out = pl.pallas_call(
        functools.partial(_linear_kernel, activation=activation),
        out_shape=jax.ShapeDtypeStruct((Mp, Np), out_dtype),
        grid=grid,
        in_specs=[
            pl.BlockSpec((tm, tk), lambda i, j, k: (i, k)),
            pl.BlockSpec((tk, tn), lambda i, j, k: (k, j)),
            pl.BlockSpec((1, tn), lambda i, j, k: (0, j)),
        ],
        out_specs=pl.BlockSpec((tm, tn), lambda i, j, k: (i, j)),
        scratch_shapes=[pltpu.VMEM((tm, tn), jnp.float32)],
        compiler_params=_mosaic(("parallel", "parallel", "arbitrary"), vmem),
    )(xp, wp, bp)
    if (Mp, Np) != (M, N):
        out = out[:M, :N]
    return out


def _flash_attn_kernel(kmask_ref, q_ref, k_ref, v_ref, o_ref,
                       m_sc, l_sc, acc_sc, *, n_heads, scale, causal):
    qi = pl.program_id(1)
    ki = pl.program_id(2)
    tq = q_ref.shape[1]
    tkv = k_ref.shape[1]
    d = q_ref.shape[-1]
    dh = d // n_heads

    @pl.when(ki == 0)
    def _():
        m_sc[...] = jnp.full_like(m_sc, NEG_INF)
        l_sc[...] = jnp.zeros_like(l_sc)
        acc_sc[...] = jnp.zeros_like(acc_sc)

    if causal:
        # XLM get_masks(causal=True): purely causal; generated in-kernel -> no (B,S,S) HBM mask
        row = jax.lax.broadcasted_iota(jnp.int32, (tq, tkv), 0) + qi * tq
        col = jax.lax.broadcasted_iota(jnp.int32, (tq, tkv), 1) + ki * tkv
        mask_add = jnp.where(col <= row, 0.0, NEG_INF).astype(jnp.float32)
    else:
        mask_add = kmask_ref[0].astype(jnp.float32)      # (1, tkv) key-padding mask

    # TODO(synk): when dh < 128 at production sizes, process heads in pairs/groups so the
    # lane slices are 128-aligned and MXU occupancy improves.
    for h in range(n_heads):
        sl = slice(h * dh, (h + 1) * dh)
        q = q_ref[0, :, sl]                              # (tq, dh)  per-head ref slice
        k = k_ref[0, :, sl]                              # (tkv, dh)
        v = v_ref[0, :, sl]
        s = jax.lax.dot_general(q, k, (((1,), (1,)), ((), ())),    # q @ k.T, no transpose
                                preferred_element_type=jnp.float32) * scale
        s = s + mask_add
        m_prev = m_sc[h]                                 # (tq, 1)
        m_new = jnp.maximum(m_prev, jnp.max(s, axis=-1, keepdims=True))
        alpha = jnp.exp(m_prev - m_new)
        p = jnp.exp(s - m_new)
        l_sc[h] = alpha * l_sc[h] + jnp.sum(p, axis=-1, keepdims=True)
        acc_sc[:, sl] = alpha * acc_sc[:, sl] + jnp.dot(
            p.astype(v.dtype), v, preferred_element_type=jnp.float32)
        m_sc[h] = m_new

    @pl.when(ki == pl.num_programs(2) - 1)
    def _():
        for h in range(n_heads):
            sl = slice(h * dh, (h + 1) * dh)
            acc_sc[:, sl] = acc_sc[:, sl] * pl.reciprocal(l_sc[h], approx=True)
        o_ref[0] = acc_sc[...].astype(o_ref.dtype)       # single lane-dense store


def pallas_flash_attention(qkv, kmask_add, *, n_heads, scale, causal):
    """qkv: (B, S, 3*D) fused projection output (bf16); kmask_add: (B, 1, S) additive
    key-padding mask. Returns (B, S, D) context in the same lane-dense layout."""
    B, S, D3 = qkv.shape
    D = D3 // 3
    tq = _seq_tile(S, TQ_CAP)
    tkv = _seq_tile(S, TKV_CAP)
    n_q, n_kv = S // tq, S // tkv

    if D % 128 == 0:
        # consume the fused projection directly: q/k/v are lane-block slices of qkv
        q_in = k_in = v_in = qkv
        q_spec = pl.BlockSpec((1, tq, D), lambda b, qi, ki: (b, qi, 0))
        k_spec = pl.BlockSpec((1, tkv, D), lambda b, qi, ki: (b, ki, 1))
        v_spec = pl.BlockSpec((1, tkv, D), lambda b, qi, ki: (b, ki, 2))
    else:
        # small / unaligned head dims (test shapes): split once in glue so lane blocks
        # equal the full last dim and stay layout-legal.
        q_in, k_in, v_in = jnp.split(qkv, 3, axis=-1)
        q_spec = pl.BlockSpec((1, tq, D), lambda b, qi, ki: (b, qi, 0))
        k_spec = pl.BlockSpec((1, tkv, D), lambda b, qi, ki: (b, ki, 0))
        v_spec = pl.BlockSpec((1, tkv, D), lambda b, qi, ki: (b, ki, 0))

    kern = functools.partial(_flash_attn_kernel, n_heads=n_heads,
                             scale=scale, causal=causal)
    vmem = (2 * ((tq * D + 2 * tkv * D) * 2 + tkv * 4 + tq * D * 2)
            + (2 * n_heads * tq * 128 + tq * D) * 4)

    return pl.pallas_call(
        kern,
        out_shape=jax.ShapeDtypeStruct((B, S, D), qkv.dtype),
        grid=(B, n_q, n_kv),                             # kv (reduction) axis last
        in_specs=[
            pl.BlockSpec((1, 1, tkv), lambda b, qi, ki: (b, 0, ki)),
            q_spec, k_spec, v_spec,
        ],
        out_specs=pl.BlockSpec((1, tq, D), lambda b, qi, ki: (b, qi, 0)),
        scratch_shapes=[
            pltpu.VMEM((n_heads, tq, 1), jnp.float32),   # running max per head
            pltpu.VMEM((n_heads, tq, 1), jnp.float32),   # running denom per head
            pltpu.VMEM((tq, D), jnp.float32),            # context accumulator
        ],
        compiler_params=_mosaic(("parallel", "parallel", "arbitrary"), vmem),
    )(kmask_add, q_in, k_in, v_in)


def _score_kernel(e_ref, emb_ref, o_ref):
    # score_tile = e @ emb_tile.T (contraction over E) without materializing emb.T
    o_ref[...] = jax.lax.dot_general(
        e_ref[...], emb_ref[...], (((1,), (1,)), ((), ())),
        preferred_element_type=jnp.float32)


def pallas_score(e, emb):
    """e: (B, E), emb: (V, E) -> score (B, V) f32; emb streamed in (tv, E) blocks over V."""
    B, E = e.shape
    V = emb.shape[0]
    tv, Vp = _pick_tile(V, TV_CAP)
    # TODO(synk): pre-pad id2vec once at parameter-load time for non-aligned production vocabs
    embp = emb if Vp == V else jnp.pad(emb, ((0, Vp - V), (0, 0)))
    nv = Vp // tv

    emb_kwargs = {}
    bufs = 2
    if nv >= 3:
        # head is HBM-bandwidth bound at real vocab sizes: deeper pipelining on the stream.
        bufs = 3
        emb_kwargs['pipeline_mode'] = pl.Buffered(3)
    emb_spec = pl.BlockSpec((tv, E), lambda j: (j, 0), **emb_kwargs)

    vmem = bufs * tv * E * 2 + 2 * (B * E * 2 + B * tv * 4)
    out = pl.pallas_call(
        _score_kernel,
        out_shape=jax.ShapeDtypeStruct((B, Vp), jnp.float32),
        grid=(nv,),
        in_specs=[
            pl.BlockSpec((B, E), lambda j: (0, 0)),      # e resident across all vocab tiles
            emb_spec,
        ],
        out_specs=pl.BlockSpec((B, tv), lambda j: (0, j)),
        compiler_params=_mosaic(("parallel",), vmem),
    )(e.astype(jnp.bfloat16), embp)
    return out if Vp == V else out[:, :V]


# ----------------------------------------------------------------------------
# Encoder (XLM TransformerModel 'fwd') — glue around the Pallas kernels
# ----------------------------------------------------------------------------

def layer_norm(x, g, b, eps=1e-12):
    xf = x.astype(jnp.float32)
    mu = jnp.mean(xf, axis=-1, keepdims=True)
    var = jnp.mean((xf - mu) ** 2, axis=-1, keepdims=True)
    y = (xf - mu) * jax.lax.rsqrt(var + eps) * g + b
    return y.astype(x.dtype)


def mha(x, kmask_add, lp, *, n_heads, causal):
    B, S, D = x.shape
    xf = x.reshape(B * S, D)
    # fused Q|K|V projection: one kernel launch, one DMA of x per layer
    qkv = pallas_linear(xf, lp['wqkv'], lp['bqkv']).reshape(B, S, 3 * D)
    ctx = pallas_flash_attention(qkv, kmask_add, n_heads=n_heads,
                                 scale=1.0 / math.sqrt(D // n_heads), causal=causal)
    return pallas_linear(ctx.reshape(B * S, D), lp['wo'], lp['bo']).reshape(B, S, D)


def ffn(x, lp):
    B, S, D = x.shape
    xf = x.reshape(B * S, D)
    h = pallas_linear(xf, lp['w1'], lp['b1'], activation='gelu')   # bias + GELU fused
    return pallas_linear(h, lp['w2'], lp['b2']).reshape(B, S, D)


def encoder_fwd(x, lengths, ep, cfg, causal=False):
    """x: (S, B) int32 token ids, lengths: (B,) -> (B, D) first-timestep states."""
    S, B = x.shape
    xt = x.T                                                       # (B, S)
    mask = jnp.arange(S)[None, :] < lengths[:, None]               # (B, S) padding mask
    # only the tiny (B,1,S) key-padding mask goes to HBM; the causal mask (if any) is
    # generated inside the attention kernel.
    kmask_add = jnp.where(mask, 0.0, NEG_INF).astype(jnp.float32)[:, None, :]

    pos = jnp.arange(S)
    h = ep['word_emb'][xt] + ep['pos_emb'][pos][None, :, :]        # f32
    h = layer_norm(h, ep['ln_emb_g'], ep['ln_emb_b'])
    h = (h * mask[..., None].astype(h.dtype)).astype(jnp.bfloat16)

    for lp in ep['layers']:
        h = h + mha(h, kmask_add, lp, n_heads=cfg['n_heads'], causal=causal)
        h = layer_norm(h, lp['ln1_g'], lp['ln1_b'])
        h = h + ffn(h, lp)
        h = layer_norm(h, lp['ln2_g'], lp['ln2_b'])
        h = h * mask[..., None].astype(h.dtype)

    # first time step (== encoder(...)[0] in the (S, B, D) convention)
    return h[:, 0, :]


def xrdict_forward(x, lengths, params, cfg, causal=False, word_gt=None, mode='test'):
    v_d = encoder_fwd(x, lengths, params['encoder'], cfg, causal=causal)     # (B, D) bf16
    # fc is an M=B (~2) matmul: a dedicated pallas_call would be pure launch/DMA overhead,
    # so it stays in plain XLA (review).
    e_d = (jnp.dot(v_d.astype(jnp.float32), params['fc_w'].astype(jnp.float32))
           + params['fc_b'])                                                 # (B, E) f32
    score = pallas_score(e_d, params['id2vec'])                              # (B, V) f32
    # torch.sort(score, dim=1, descending=True) -> indices (tie order may differ)
    word_ids = jnp.argsort(-score, axis=1)
    if mode == 'train':
        logp = jax.nn.log_softmax(score, axis=1)
        loss = -jnp.mean(logp[jnp.arange(score.shape[0]), word_gt])
        return loss, score, word_ids
    return score, word_ids


# ----------------------------------------------------------------------------
# Deterministic parameter construction (synthetic stand-in for the checkpoint)
# ----------------------------------------------------------------------------

def init_params(key, *, n_words=64, dim=32, n_heads=4, n_layers=2,
                hidden=128, max_pos=64, target_vocab=48, emb_dim=16):
    keys = iter(jax.random.split(key, 128))

    def nrm(shape, scale=0.02, dtype=jnp.bfloat16):
        return (scale * jax.random.normal(next(keys), shape)).astype(dtype)

    def zeros(n):
        return jnp.zeros((n,), jnp.float32)

    layers = []
    for _ in range(n_layers):
        wq, wk, wv = nrm((dim, dim)), nrm((dim, dim)), nrm((dim, dim))
        layers.append(dict(
            wqkv=jnp.concatenate([wq, wk, wv], axis=1),    # fused (D, 3D) bf16 (pre-cast)
            bqkv=jnp.concatenate([zeros(dim)] * 3, axis=0),
            wo=nrm((dim, dim)), bo=zeros(dim),
            w1=nrm((dim, hidden)), b1=zeros(hidden),
            w2=nrm((hidden, dim)), b2=zeros(dim),
            ln1_g=jnp.ones((dim,), jnp.float32), ln1_b=zeros(dim),
            ln2_g=jnp.ones((dim,), jnp.float32), ln2_b=zeros(dim),
        ))

    encoder = dict(
        word_emb=nrm((n_words, dim), dtype=jnp.float32),   # dico vocab embeddings
        pos_emb=nrm((max_pos, dim), dtype=jnp.float32),
        ln_emb_g=jnp.ones((dim,), jnp.float32),
        ln_emb_b=zeros(dim),
        layers=layers,
    )
    params = dict(
        encoder=encoder,
        fc_w=nrm((dim, emb_dim)),                          # nn.Linear(encoder.dim, emb_dim)
        fc_b=zeros(emb_dim),
        id2vec=nrm((target_vocab, emb_dim)),               # frozen vocab.id2vec, bf16 pre-cast
    )
    # static hyper-parameters live OUTSIDE the traced pytree (fixes ConcretizationTypeError)
    cfg = dict(n_heads=n_heads, n_layers=n_layers, dim=dim, hidden=hidden, emb_dim=emb_dim)
    return params, cfg


# ----------------------------------------------------------------------------

if __name__ == "__main__":
    key = jax.random.PRNGKey(0)
    pkey, xkey = jax.random.split(key)

    N_WORDS, TARGET_VOCAB = 64, 48
    S, B = 8, 2

    params, cfg = init_params(pkey, n_words=N_WORDS, target_vocab=TARGET_VOCAB)

    x = jax.random.randint(xkey, (S, B), 0, N_WORDS, dtype=jnp.int32)
    lengths = jnp.array([8, 5], dtype=jnp.int32)

    fwd = jax.jit(lambda x_, l_, p_: xrdict_forward(x_, l_, p_, cfg, mode='test'))
    score, word_ids = fwd(x, lengths, params)
    jax.block_until_ready((score, word_ids))

    assert score.shape == (B, TARGET_VOCAB)
    assert word_ids.shape == (B, TARGET_VOCAB)
    print("KERNEL_OK")
</pallas_src>

<mosaic_0001>
module attributes {stable_mosaic.version = 11 : i64} {
  func.func @_linear_kernel(%arg0: i32, %arg1: i32, %arg2: i32, %arg3: memref<16x32xbf16, #tpu.memory_space<vmem>>, %arg4: memref<32x96xbf16, #tpu.memory_space<vmem>>, %arg5: memref<1x96xf32, #tpu.memory_space<vmem>>, %arg6: memref<16x96xbf16, #tpu.memory_space<vmem>>, %arg7: memref<16x96xf32, #tpu.memory_space<vmem>>) attributes {dimension_semantics = [#tpu.dimension_semantics<parallel>, #tpu.dimension_semantics<parallel>, #tpu.dimension_semantics<arbitrary>], iteration_bounds = array<i64: 1, 1, 1>, scalar_prefetch = 0 : i64, scratch_operands = 1 : i64, tpu.core_type = #tpu.core_type<tc>, window_params = [{transform_indices = @transform_0, window_bounds = array<i64: 16, 32>}, {transform_indices = @transform_1, window_bounds = array<i64: 32, 96>}, {transform_indices = @transform_2, window_bounds = array<i64: 1, 96>}, {transform_indices = @transform_3, window_bounds = array<i64: 16, 96>}]} {
    %c0_i32 = arith.constant 0 : i32
    %0 = arith.cmpi eq, %arg2, %c0_i32 : i32
    %1 = arith.extui %0 : i1 to i32
    %c0_i32_0 = arith.constant 0 : i32
    %2 = arith.cmpi ne, %1, %c0_i32_0 : i32
    scf.if %2 {
      %cst_10 = arith.constant 0.000000e+00 : f32
      %12 = vector.broadcast %cst_10 : f32 to vector<16x96xf32>
      %c0_11 = arith.constant 0 : index
      %c0_12 = arith.constant 0 : index
      %13 = vector.load %arg7[%c0_11, %c0_12] : memref<16x96xf32, #tpu.memory_space<vmem>>, vector<16x96xf32>
      tpu.vector_store %arg7[%c0_11, %c0_12], %12 {strides = array<i32>} : memref<16x96xf32, #tpu.memory_space<vmem>>, vector<16x96xf32>,
    } else {
    }
    %c0 = arith.constant 0 : index
    %c0_1 = arith.constant 0 : index
    %3 = vector.load %arg7[%c0, %c0_1] : memref<16x96xf32, #tpu.memory_space<vmem>>, vector<16x96xf32>
    %c0_2 = arith.constant 0 : index
    %c0_3 = arith.constant 0 : index
    %4 = vector.load %arg3[%c0_2, %c0_3] : memref<16x32xbf16, #tpu.memory_space<vmem>>, vector<16x32xbf16>
    %c0_4 = arith.constant 0 : index
    %c0_5 = arith.constant 0 : index
    %5 = vector.load %arg4[%c0_4, %c0_5] : memref<32x96xbf16, #tpu.memory_space<vmem>>, vector<32x96xbf16>
    %cst = arith.constant dense<0.000000e+00> : vector<16x96xf32>
    %6 = tpu.matmul %4, %5, %cst {dimension_numbers = #tpu.dot_dimension_numbers<[1], [0], [0], [1], [0, 0, 1, 1], [], []>} : vector<16x32xbf16>, vector<32x96xbf16>, vector<16x96xf32> -> vector<16x96xf32>
    %7 = arith.addf %3, %6 : vector<16x96xf32>
    %c0_6 = arith.constant 0 : index
    %c0_7 = arith.constant 0 : index
    %8 = vector.load %arg7[%c0_6, %c0_7] : memref<16x96xf32, #tpu.memory_space<vmem>>, vector<16x96xf32>
    tpu.vector_store %arg7[%c0_6, %c0_7], %7 {strides = array<i32>} : memref<16x96xf32, #tpu.memory_space<vmem>>, vector<16x96xf32>,
    %c0_i32_8 = arith.constant 0 : i32
    %9 = arith.cmpi eq, %arg2, %c0_i32_8 : i32
    %10 = arith.extui %9 : i1 to i32
    %c0_i32_9 = arith.constant 0 : i32
    %11 = arith.cmpi ne, %10, %c0_i32_9 : i32
    scf.if %11 {
      %c0_10 = arith.constant 0 : index
      %c0_11 = arith.constant 0 : index
      %12 = vector.load %arg7[%c0_10, %c0_11] : memref<16x96xf32, #tpu.memory_space<vmem>>, vector<16x96xf32>
      %c0_12 = arith.constant 0 : index
      %c0_13 = arith.constant 0 : index
      %13 = vector.load %arg5[%c0_12, %c0_13] : memref<1x96xf32, #tpu.memory_space<vmem>>, vector<1x96xf32>
      %14 = vector.broadcast %13 : vector<1x96xf32> to vector<16x96xf32>
      %15 = arith.addf %12, %14 : vector<16x96xf32>
      %16 = arith.truncf %15 : vector<16x96xf32> to vector<16x96xbf16>
      %c0_14 = arith.constant 0 : index
      %c0_15 = arith.constant 0 : index
      %17 = vector.load %arg6[%c0_14, %c0_15] : memref<16x96xbf16, #tpu.memory_space<vmem>>, vector<16x96xbf16>
      tpu.vector_store %arg6[%c0_14, %c0_15], %16 {strides = array<i32>} : memref<16x96xbf16, #tpu.memory_space<vmem>>, vector<16x96xbf16>,
    } else {
    }
    return
  }
  func.func @transform_0(%arg0: i32, %arg1: i32, %arg2: i32) -> (i32, i32) {
    %c0_i32 = arith.constant 0 : i32
    return %arg0, %arg2 : i32, i32
  }
  func.func @transform_1(%arg0: i32, %arg1: i32, %arg2: i32) -> (i32, i32) {
    %c0_i32 = arith.constant 0 : i32
    return %arg2, %arg1 : i32, i32
  }
  func.func @transform_2(%arg0: i32, %arg1: i32, %arg2: i32) -> (i32, i32) {
    %c0_i32 = arith.constant 0 : i32
    %c0_i32_0 = arith.constant 0 : i32
    return %c0_i32, %arg1 : i32, i32
  }
  func.func @transform_3(%arg0: i32, %arg1: i32, %arg2: i32) -> (i32, i32) {
    %c0_i32 = arith.constant 0 : i32
    return %arg0, %arg1 : i32, i32
  }
}

module attributes {stable_mosaic.version = 11 : i64} {
  func.func @_linear_kernel(%arg0: i32, %arg1: i32, %arg2: i32, %arg3: memref<16x32xbf16, #tpu.memory_space<vmem>>, %arg4: memref<32x32xbf16, #tpu.memory_space<vmem>>, %arg5: memref<1x32xf32, #tpu.memory_space<vmem>>, %arg6: memref<16x32xbf16, #tpu.memory_space<vmem>>, %arg7: memref<16x32xf32, #tpu.memory_space<vmem>>) attributes {dimension_semantics = [#tpu.dimension_semantics<parallel>, #tpu.dimension_semantics<parallel>, #tpu.dimension_semantics<arbitrary>], iteration_bounds = array<i64: 1, 1, 1>, scalar_prefetch = 0 : i64, scratch_operands = 1 : i64, tpu.core_type = #tpu.core_type<tc>, window_params = [{transform_indices = @transform_0, window_bounds = array<i64: 16, 32>}, {transform_indices = @transform_1, window_bounds = array<i64: 32, 32>}, {transform_indices = @transform_2, window_bounds = array<i64: 1, 32>}, {transform_indices = @transform_3, window_bounds = array<i64: 16, 32>}]} {
    %c0_i32 = arith.constant 0 : i32
    %0 = arith.cmpi eq, %arg2, %c0_i32 : i32
    %1 = arith.extui %0 : i1 to i32
    %c0_i32_0 = arith.constant 0 : i32
    %2 = arith.cmpi ne, %1, %c0_i32_0 : i32
    scf.if %2 {
      %cst_10 = arith.constant 0.000000e+00 : f32
      %12 = vector.broadcast %cst_10 : f32 to vector<16x32xf32>
      %c0_11 = arith.constant 0 : index
      %c0_12 = arith.constant 0 : index
      %13 = vector.load %arg7[%c0_11, %c0_12] : memref<16x32xf32, #tpu.memory_space<vmem>>, vector<16x32xf32>
      tpu.vector_store %arg7[%c0_11, %c0_12], %12 {strides = array<i32>} : memref<16x32xf32, #tpu.memory_space<vmem>>, vector<16x32xf32>,
    } else {
    }
    %c0 = arith.constant 0 : index
    %c0_1 = arith.constant 0 : index
    %3 = vector.load %arg7[%c0, %c0_1] : memref<16x32xf32, #tpu.memory_space<vmem>>, vector<16x32xf32>
    %c0_2 = arith.constant 0 : index
    %c0_3 = arith.constant 0 : index
    %4 = vector.load %arg3[%c0_2, %c0_3] : memref<16x32xbf16, #tpu.memory_space<vmem>>, vector<16x32xbf16>
    %c0_4 = arith.constant 0 : index
    %c0_5 = arith.constant 0 : index
    %5 = vector.load %arg4[%c0_4, %c0_5] : memref<32x32xbf16, #tpu.memory_space<vmem>>, vector<32x32xbf16>
    %cst = arith.constant dense<0.000000e+00> : vector<16x32xf32>
    %6 = tpu.matmul %4, %5, %cst {dimension_numbers = #tpu.dot_dimension_numbers<[1], [0], [0], [1], [0, 0, 1, 1], [], []>} : vector<16x32xbf16>, vector<32x32xbf16>, vector<16x32xf32> -> vector<16x32xf32>
    %7 = arith.addf %3, %6 : vector<16x32xf32>
    %c0_6 = arith.constant 0 : index
    %c0_7 = arith.constant 0 : index
    %8 = vector.load %arg7[%c0_6, %c0_7] : memref<16x32xf32, #tpu.memory_space<vmem>>, vector<16x32xf32>
    tpu.vector_store %arg7[%c0_6, %c0_7], %7 {strides = array<i32>} : memref<16x32xf32, #tpu.memory_space<vmem>>, vector<16x32xf32>,
    %c0_i32_8 = arith.constant 0 : i32
    %9 = arith.cmpi eq, %arg2, %c0_i32_8 : i32
    %10 = arith.extui %9 : i1 to i32
    %c0_i32_9 = arith.constant 0 : i32
    %11 = arith.cmpi ne, %10, %c0_i32_9 : i32
    scf.if %11 {
      %c0_10 = arith.constant 0 : index
      %c0_11 = arith.constant 0 : index
      %12 = vector.load %arg7[%c0_10, %c0_11] : memref<16x32xf32, #tpu.memory_space<vmem>>, vector<16x32xf32>
      %c0_12 = arith.constant 0 : index
      %c0_13 = arith.constant 0 : index
      %13 = vector.load %arg5[%c0_12, %c0_13] : memref<1x32xf32, #tpu.memory_space<vmem>>, vector<1x32xf32>
      %14 = vector.broadcast %13 : vector<1x32xf32> to vector<16x32xf32>
      %15 = arith.addf %12, %14 : vector<16x32xf32>
      %16 = arith.truncf %15 : vector<16x32xf32> to vector<16x32xbf16>
      %c0_14 = arith.constant 0 : index
      %c0_15 = arith.constant 0 : index
      %17 = vector.load %arg6[%c0_14, %c0_15] : memref<16x32xbf16, #tpu.memory_space<vmem>>, vector<16x32xbf16>
      tpu.vector_store %arg6[%c0_14, %c0_15], %16 {strides = array<i32>} : memref<16x32xbf16, #tpu.memory_space<vmem>>, vector<16x32xbf16>,
    } else {
    }
    return
  }
  func.func @transform_0(%arg0: i32, %arg1: i32, %arg2: i32) -> (i32, i32) {
    %c0_i32 = arith.constant 0 : i32
    return %arg0, %arg2 : i32, i32
  }
  func.func @transform_1(%arg0: i32, %arg1: i32, %arg2: i32) -> (i32, i32) {
    %c0_i32 = arith.constant 0 : i32
    return %arg2, %arg1 : i32, i32
  }
  func.func @transform_2(%arg0: i32, %arg1: i32, %arg2: i32) -> (i32, i32) {
    %c0_i32 = arith.constant 0 : i32
    %c0_i32_0 = arith.constant 0 : i32
    return %c0_i32, %arg1 : i32, i32
  }
  func.func @transform_3(%arg0: i32, %arg1: i32, %arg2: i32) -> (i32, i32) {
    %c0_i32 = arith.constant 0 : i32
    return %arg0, %arg1 : i32, i32
  }
}

module attributes {stable_mosaic.version = 11 : i64} {
  func.func @_flash_attn_kernel(%arg0: i32, %arg1: i32, %arg2: i32, %arg3: memref<1x1x8xf32, #tpu.memory_space<vmem>>, %arg4: memref<1x8x32xbf16, #tpu.memory_space<vmem>>, %arg5: memref<1x8x32xbf16, #tpu.memory_space<vmem>>, %arg6: memref<1x8x32xbf16, #tpu.memory_space<vmem>>, %arg7: memref<1x8x32xbf16, #tpu.memory_space<vmem>>, %arg8: memref<4x8x1xf32, #tpu.memory_space<vmem>>, %arg9: memref<4x8x1xf32, #tpu.memory_space<vmem>>, %arg10: memref<8x32xf32, #tpu.memory_space<vmem>>) attributes {dimension_semantics = [#tpu.dimension_semantics<parallel>, #tpu.dimension_semantics<parallel>, #tpu.dimension_semantics<arbitrary>], iteration_bounds = array<i64: 2, 1, 1>, scalar_prefetch = 0 : i64, scratch_operands = 3 : i64, tpu.core_type = #tpu.core_type<tc>, window_params = [{transform_indices = @transform_0, window_bounds = array<i64: 1, 1, 8>}, {transform_indices = @transform_1, window_bounds = array<i64: 1, 8, 32>}, {transform_indices = @transform_2, window_bounds = array<i64: 1, 8, 32>}, {transform_indices = @transform_3, window_bounds = array<i64: 1, 8, 32>}, {transform_indices = @transform_4, window_bounds = array<i64: 1, 8, 32>}]} {
    %c0_i32 = arith.constant 0 : i32
    %0 = arith.cmpi eq, %arg2, %c0_i32 : i32
    %1 = arith.extui %0 : i1 to i32
    %c0_i32_0 = arith.constant 0 : i32
    %2 = arith.cmpi ne, %1, %c0_i32_0 : i32
    scf.if %2 {
      %cst_118 = arith.constant -1.000000e+09 : f32
      %168 = vector.broadcast %cst_118 : f32 to vector<4x8x1xf32>
      %c0_119 = arith.constant 0 : index
      %c0_120 = arith.constant 0 : index
      %c0_121 = arith.constant 0 : index
      %169 = vector.load %arg8[%c0_119, %c0_120, %c0_121] : memref<4x8x1xf32, #tpu.memory_space<vmem>>, vector<4x8x1xf32>
      tpu.vector_store %arg8[%c0_119, %c0_120, %c0_121], %168 {strides = array<i32>} : memref<4x8x1xf32, #tpu.memory_space<vmem>>, vector<4x8x1xf32>,
      %cst_122 = arith.constant 0.000000e+00 : f32
      %170 = vector.broadcast %cst_122 : f32 to vector<4x8x1xf32>
      %c0_123 = arith.constant 0 : index
      %c0_124 = arith.constant 0 : index
      %c0_125 = arith.constant 0 : index
      %171 = vector.load %arg9[%c0_123, %c0_124, %c0_125] : memref<4x8x1xf32, #tpu.memory_space<vmem>>, vector<4x8x1xf32>
      tpu.vector_store %arg9[%c0_123, %c0_124, %c0_125], %170 {strides = array<i32>} : memref<4x8x1xf32, #tpu.memory_space<vmem>>, vector<4x8x1xf32>,
      %cst_126 = arith.constant 0.000000e+00 : f32
      %172 = vector.broadcast %cst_126 : f32 to vector<8x32xf32>
      %c0_127 = arith.constant 0 : index
      %c0_128 = arith.constant 0 : index
      %173 = vector.load %arg10[%c0_127, %c0_128] : memref<8x32xf32, #tpu.memory_space<vmem>>, vector<8x32xf32>
      tpu.vector_store %arg10[%c0_127, %c0_128], %172 {strides = array<i32>} : memref<8x32xf32, #tpu.memory_space<vmem>>, vector<8x32xf32>,
    } else {
    }
    %c0 = arith.constant 0 : index
    %c0_1 = arith.constant 0 : index
    %c0_2 = arith.constant 0 : index
    %3 = vector.load %arg3[%c0, %c0_1, %c0_2] : memref<1x1x8xf32, #tpu.memory_space<vmem>>, vector<1x1x8xf32>
    %4 = vector.shape_cast %3 : vector<1x1x8xf32> to vector<1x8xf32>
    %c0_3 = arith.constant 0 : index
    %c0_4 = arith.constant 0 : index
    %c0_5 = arith.constant 0 : index
    %5 = vector.load %arg4[%c0_3, %c0_4, %c0_5] : memref<1x8x32xbf16, #tpu.memory_space<vmem>>, vector<1x8x8xbf16>
    %6 = vector.shape_cast %5 : vector<1x8x8xbf16> to vector<8x8xbf16>
    %c0_6 = arith.constant 0 : index
    %c0_7 = arith.constant 0 : index
    %c0_8 = arith.constant 0 : index
    %7 = vector.load %arg5[%c0_6, %c0_7, %c0_8] : memref<1x8x32xbf16, #tpu.memory_space<vmem>>, vector<1x8x8xbf16>
    %8 = vector.shape_cast %7 : vector<1x8x8xbf16> to vector<8x8xbf16>
    %c0_9 = arith.constant 0 : index
    %c0_10 = arith.constant 0 : index
    %c0_11 = arith.constant 0 : index
    %9 = vector.load %arg6[%c0_9, %c0_10, %c0_11] : memref<1x8x32xbf16, #tpu.memory_space<vmem>>, vector<1x8x8xbf16>
    %10 = vector.shape_cast %9 : vector<1x8x8xbf16> to vector<8x8xbf16>
    %cst = arith.constant dense<0.000000e+00> : vector<8x8xf32>
    %11 = tpu.matmul %6, %8, %cst {dimension_numbers = #tpu.dot_dimension_numbers<[1], [1], [0], [0], [0, 0, 1, 0], [], []>} : vector<8x8xbf16>, vector<8x8xbf16>, vector<8x8xf32> -> vector<8x8xf32>
    %cst_12 = arith.constant 0.353553385 : f32
    %12 = vector.broadcast %cst_12 : f32 to vector<8x8xf32>
    %13 = arith.mulf %11, %12 : vector<8x8xf32>
    %14 = vector.broadcast %4 : vector<1x8xf32> to vector<8x8xf32>
    %15 = arith.addf %13, %14 : vector<8x8xf32>
    %c0_13 = arith.constant 0 : index
    %c0_14 = arith.constant 0 : index
    %c0_15 = arith.constant 0 : index
    %16 = vector.load %arg8[%c0_13, %c0_14, %c0_15] : memref<4x8x1xf32, #tpu.memory_space<vmem>>, vector<1x8x1xf32>
    %17 = vector.shape_cast %16 : vector<1x8x1xf32> to vector<8x1xf32>
    %cst_16 = arith.constant dense<0xFF800000> : vector<8xf32>
    %18 = vector.multi_reduction <maximumf>, %15, %cst_16 [1] : vector<8x8xf32> to vector<8xf32>
    %19 = vector.shape_cast %18 : vector<8xf32> to vector<8x1xf32>
    %20 = arith.maximumf %17, %19 : vector<8x1xf32>
    %21 = arith.subf %17, %20 : vector<8x1xf32>
    %22 = math.exp %21 : vector<8x1xf32>
    %23 = vector.broadcast %20 : vector<8x1xf32> to vector<8x8xf32>
    %24 = arith.subf %15, %23 : vector<8x8xf32>
    %25 = math.exp %24 : vector<8x8xf32>
    %c0_17 = arith.constant 0 : index
    %c0_18 = arith.constant 0 : index
    %c0_19 = arith.constant 0 : index
    %26 = vector.load %arg9[%c0_17, %c0_18, %c0_19] : memref<4x8x1xf32, #tpu.memory_space<vmem>>, vector<1x8x1xf32>
    %27 = vector.shape_cast %26 : vector<1x8x1xf32> to vector<8x1xf32>
    %28 = arith.mulf %22, %27 : vector<8x1xf32>
    %cst_20 = arith.constant dense<0.000000e+00> : vector<8xf32>
    %29 = vector.multi_reduction <add>, %25, %cst_20 [1] : vector<8x8xf32> to vector<8xf32>
    %30 = vector.shape_cast %29 : vector<8xf32> to vector<8x1xf32>
    %31 = arith.addf %28, %30 : vector<8x1xf32>
    %c0_21 = arith.constant 0 : index
    %c0_22 = arith.constant 0 : index
    %c0_23 = arith.constant 0 : index
    %32 = vector.load %arg9[%c0_21, %c0_22, %c0_23] : memref<4x8x1xf32, #tpu.memory_space<vmem>>, vector<1x8x1xf32>
    %33 = vector.shape_cast %32 : vector<1x8x1xf32> to vector<8x1xf32>
    %34 = vector.shape_cast %31 : vector<8x1xf32> to vector<1x8x1xf32>
    tpu.vector_store %arg9[%c0_21, %c0_22, %c0_23], %34 {strides = array<i32>} : memref<4x8x1xf32, #tpu.memory_space<vmem>>, vector<1x8x1xf32>,
    %c0_24 = arith.constant 0 : index
    %c0_25 = arith.constant 0 : index
    %35 = vector.load %arg10[%c0_24, %c0_25] : memref<8x32xf32, #tpu.memory_space<vmem>>, vector<8x8xf32>
    %36 = vector.broadcast %22 : vector<8x1xf32> to vector<8x8xf32>
    %37 = arith.mulf %36, %35 : vector<8x8xf32>
    %38 = arith.truncf %25 : vector<8x8xf32> to vector<8x8xbf16>
    %cst_26 = arith.constant dense<0.000000e+00> : vector<8x8xf32>
    %39 = tpu.matmul %38, %10, %cst_26 {dimension_numbers = #tpu.dot_dimension_numbers<[1], [0], [0], [1], [0, 0, 1, 1], [], []>} : vector<8x8xbf16>, vector<8x8xbf16>, vector<8x8xf32> -> vector<8x8xf32>
    %40 = arith.addf %37, %39 : vector<8x8xf32>
    %c0_27 = arith.constant 0 : index
    %c0_28 = arith.constant 0 : index
    %41 = vector.load %arg10[%c0_27, %c0_28] : memref<8x32xf32, #tpu.memory_space<vmem>>, vector<8x8xf32>
    tpu.vector_store %arg10[%c0_27, %c0_28], %40 {strides = array<i32>} : memref<8x32xf32, #tpu.memory_space<vmem>>, vector<8x8xf32>,
    %c0_29 = arith.constant 0 : index
    %c0_30 = arith.constant 0 : index
    %c0_31 = arith.constant 0 : index
    %42 = vector.load %arg8[%c0_29, %c0_30, %c0_31] : memref<4x8x1xf32, #tpu.memory_space<vmem>>, vector<1x8x1xf32>
    %43 = vector.shape_cast %42 : vector<1x8x1xf32> to vector<8x1xf32>
    %44 = vector.shape_cast %20 : vector<8x1xf32> to vector<1x8x1xf32>
    tpu.vector_store %arg8[%c0_29, %c0_30, %c0_31], %44 {strides = array<i32>} : memref<4x8x1xf32, #tpu.memory_space<vmem>>, vector<1x8x1xf32>,
    %c0_32 = arith.constant 0 : index
    %c0_33 = arith.constant 0 : index
    %c8 = arith.constant 8 : index
    %45 = vector.load %arg4[%c0_32, %c0_33, %c8] : memref<1x8x32xbf16, #tpu.memory_space<vmem>>, vector<1x8x8xbf16>
    %46 = vector.shape_cast %45 : vector<1x8x8xbf16> to vector<8x8xbf16>
    %c0_34 = arith.constant 0 : index
    %c0_35 = arith.constant 0 : index
    %c8_36 = arith.constant 8 : index
    %47 = vector.load %arg5[%c0_34, %c0_35, %c8_36] : memref<1x8x32xbf16, #tpu.memory_space<vmem>>, vector<1x8x8xbf16>
    %48 = vector.shape_cast %47 : vector<1x8x8xbf16> to vector<8x8xbf16>
    %c0_37 = arith.constant 0 : index
    %c0_38 = arith.constant 0 : index
    %c8_39 = arith.constant 8 : index
    %49 = vector.load %arg6[%c0_37, %c0_38, %c8_39] : memref<1x8x32xbf16, #tpu.memory_space<vmem>>, vector<1x8x8xbf16>
    %50 = vector.shape_cast %49 : vector<1x8x8xbf16> to vector<8x8xbf16>
    %cst_40 = arith.constant dense<0.000000e+00> : vector<8x8xf32>
    %51 = tpu.matmul %46, %48, %cst_40 {dimension_numbers = #tpu.dot_dimension_numbers<[1], [1], [0], [0], [0, 0, 1, 0], [], []>} : vector<8x8xbf16>, vector<8x8xbf16>, vector<8x8xf32> -> vector<8x8xf32>
    %cst_41 = arith.constant 0.353553385 : f32
    %52 = vector.broadcast %cst_41 : f32 to vector<8x8xf32>
    %53 = arith.mulf %51, %52 : vector<8x8xf32>
    %54 = vector.broadcast %4 : vector<1x8xf32> to vector<8x8xf32>
    %55 = arith.addf %53, %54 : vector<8x8xf32>
    %c1 = arith.constant 1 : index
    %c0_42 = arith.constant 0 : index
    %c0_43 = arith.constant 0 : index
    %56 = vector.load %arg8[%c1, %c0_42, %c0_43] : memref<4x8x1xf32, #tpu.memory_space<vmem>>, vector<1x8x1xf32>
    %57 = vector.shape_cast %56 : vector<1x8x1xf32> to vector<8x1xf32>
    %cst_44 = arith.constant dense<0xFF800000> : vector<8xf32>
    %58 = vector.multi_reduction <maximumf>, %55, %cst_44 [1] : vector<8x8xf32> to vector<8xf32>
    %59 = vector.shape_cast %58 : vector<8xf32> to vector<8x1xf32>
    %60 = arith.maximumf %57, %59 : vector<8x1xf32>
    %61 = arith.subf %57, %60 : vector<8x1xf32>
    %62 = math.exp %61 : vector<8x1xf32>
    %63 = vector.broadcast %60 : vector<8x1xf32> to vector<8x8xf32>
    %64 = arith.subf %55, %63 : vector<8x8xf32>
    %65 = math.exp %64 : vector<8x8xf32>
    %c1_45 = arith.constant 1 : index
    %c0_46 = arith.constant 0 : index
    %c0_47 = arith.constant 0 : index
    %66 = vector.load %arg9[%c1_45, %c0_46, %c0_47] : memref<4x8x1xf32, #tpu.memory_space<vmem>>, vector<1x8x1xf32>
    %67 = vector.shape_cast %66 : vector<1x8x1xf32> to vector<8x1xf32>
    %68 = arith.mulf %62, %67 : vector<8x1xf32>
    %cst_48 = arith.constant dense<0.000000e+00> : vector<8xf32>
    %69 = vector.multi_reduction <add>, %65, %cst_48 [1] : vector<8x8xf32> to vector<8xf32>
    %70 = vector.shape_cast %69 : vector<8xf32> to vector<8x1xf32>
    %71 = arith.addf %68, %70 : vector<8x1xf32>
    %c1_49 = arith.constant 1 : index
    %c0_50 = arith.constant 0 : index
    %c0_51 = arith.constant 0 : index
    %72 = vector.load %arg9[%c1_49, %c0_50, %c0_51] : memref<4x8x1xf32, #tpu.memory_space<vmem>>, vector<1x8x1xf32>
    %73 = vector.shape_cast %72 : vector<1x8x1xf32> to vector<8x1xf32>
    %74 = vector.shape_cast %71 : vector<8x1xf32> to vector<1x8x1xf32>
    tpu.vector_store %arg9[%c1_49, %c0_50, %c0_51], %74 {strides = array<i32>} : memref<4x8x1xf32, #tpu.memory_space<vmem>>, vector<1x8x1xf32>,
    %c0_52 = arith.constant 0 : index
    %c8_53 = arith.constant 8 : index
    %75 = vector.load %arg10[%c0_52, %c8_53] : memref<8x32xf32, #tpu.memory_space<vmem>>, vector<8x8xf32>
    %76 = vector.broadcast %62 : vector<8x1xf32> to vector<8x8xf32>
    %77 = arith.mulf %76, %75 : vector<8x8xf32>
    %78 = arith.truncf %65 : vector<8x8xf32> to vector<8x8xbf16>
    %cst_54 = arith.constant dense<0.000000e+00> : vector<8x8xf32>
    %79 = tpu.matmul %78, %50, %cst_54 {dimension_numbers = #tpu.dot_dimension_numbers<[1], [0], [0], [1], [0, 0, 1, 1], [], []>} : vector<8x8xbf16>, vector<8x8xbf16>, vector<8x8xf32> -> vector<8x8xf32>
    %80 = arith.addf %77, %79 : vector<8x8xf32>
    %c0_55 = arith.constant 0 : index
    %c8_56 = arith.constant 8 : index
    %81 = vector.load %arg10[%c0_55, %c8_56] : memref<8x32xf32, #tpu.memory_space<vmem>>, vector<8x8xf32>
    tpu.vector_store %arg10[%c0_55, %c8_56], %80 {strides = array<i32>} : memref<8x32xf32, #tpu.memory_space<vmem>>, vector<8x8xf32>,
    %c1_57 = arith.constant 1 : index
    %c0_58 = arith.constant 0 : index
    %c0_59 = arith.constant 0 : index
    %82 = vector.load %arg8[%c1_57, %c0_58, %c0_59] : memref<4x8x1xf32, #tpu.memory_space<vmem>>, vector<1x8x1xf32>
    %83 = vector.shape_cast %82 : vector<1x8x1xf32> to vector<8x1xf32>
    %84 = vector.shape_cast %60 : vector<8x1xf32> to vector<1x8x1xf32>
    tpu.vector_store %arg8[%c1_57, %c0_58, %c0_59], %84 {strides = array<i32>} : memref<4x8x1xf32, #tpu.memory_space<vmem>>, vector<1x8x1xf32>,
    %c0_60 = arith.constant 0 : index
    %c0_61 = arith.constant 0 : index
    %c16 = arith.constant 16 : index
    %85 = vector.load %arg4[%c0_60, %c0_61, %c16] : memref<1x8x32xbf16, #tpu.memory_space<vmem>>, vector<1x8x8xbf16>
    %86 = vector.shape_cast %85 : vector<1x8x8xbf16> to vector<8x8xbf16>
    %c0_62 = arith.constant 0 : index
    %c0_63 = arith.constant 0 : index
    %c16_64 = arith.constant 16 : index
    %87 = vector.load %arg5[%c0_62, %c0_63, %c16_64] : memref<1x8x32xbf16, #tpu.memory_space<vmem>>, vector<1x8x8xbf16>
    %88 = vector.shape_cast %87 : vector<1x8x8xbf16> to vector<8x8xbf16>
    %c0_65 = arith.constant 0 : index
    %c0_66 = arith.constant 0 : index
    %c16_67 = arith.constant 16 : index
    %89 = vector.load %arg6[%c0_65, %c0_66, %c16_67] : memref<1x8x32xbf16, #tpu.memory_space<vmem>>, vector<1x8x8xbf16>
    %90 = vector.shape_cast %89 : vector<1x8x8xbf16> to vector<8x8xbf16>
    %cst_68 = arith.constant dense<0.000000e+00> : vector<8x8xf32>
    %91 = tpu.matmul %86, %88, %cst_68 {dimension_numbers = #tpu.dot_dimension_numbers<[1], [1], [0], [0], [0, 0, 1, 0], [], []>} : vector<8x8xbf16>, vector<8x8xbf16>, vector<8x8xf32> -> vector<8x8xf32>
    %cst_69 = arith.constant 0.353553385 : f32
    %92 = vector.broadcast %cst_69 : f32 to vector<8x8xf32>
    %93 = arith.mulf %91, %92 : vector<8x8xf32>
    %94 = vector.broadcast %4 : vector<1x8xf32> to vector<8x8xf32>
    %95 = arith.addf %93, %94 : vector<8x8xf32>
    %c2 = arith.constant 2 : index
    %c0_70 = arith.constant 0 : index
    %c0_71 = arith.constant 0 : index
    %96 = vector.load %arg8[%c2, %c0_70, %c0_71] : memref<4x8x1xf32, #tpu.memory_space<vmem>>, vector<1x8x1xf32>
    %97 = vector.shape_cast %96 : vector<1x8x1xf32> to vector<8x1xf32>
    %cst_72 = arith.constant dense<0xFF800000> : vector<8xf32>
    %98 = vector.multi_reduction <maximumf>, %95, %cst_72 [1] : vector<8x8xf32> to vector<8xf32>
    %99 = vector.shape_cast %98 : vector<8xf32> to vector<8x1xf32>
    %100 = arith.maximumf %97, %99 : vector<8x1xf32>
    %101 = arith.subf %97, %100 : vector<8x1xf32>
    %102 = math.exp %101 : vector<8x1xf32>
    %103 = vector.broadcast %100 : vector<8x1xf32> to vector<8x8xf32>
    %104 = arith.subf %95, %103 : vector<8x8xf32>
    %105 = math.exp %104 : vector<8x8xf32>
    %c2_73 = arith.constant 2 : index
    %c0_74 = arith.constant 0 : index
    %c0_75 = arith.constant 0 : index
    %106 = vector.load %arg9[%c2_73, %c0_74, %c0_75] : memref<4x8x1xf32, #tpu.memory_space<vmem>>, vector<1x8x1xf32>
    %107 = vector.shape_cast %106 : vector<1x8x1xf32> to vector<8x1xf32>
    %108 = arith.mulf %102, %107 : vector<8x1xf32>
    %cst_76 = arith.constant dense<0.000000e+00> : vector<8xf32>
    %109 = vector.multi_reduction <add>, %105, %cst_76 [1] : vector<8x8xf32> to vector<8xf32>
    %110 = vector.shape_cast %109 : vector<8xf32> to vector<8x1xf32>
    %111 = arith.addf %108, %110 : vector<8x1xf32>
    %c2_77 = arith.constant 2 : index
    %c0_78 = arith.constant 0 : index
    %c0_79 = arith.constant 0 : index
    %112 = vector.load %arg9[%c2_77, %c0_78, %c0_79] : memref<4x8x1xf32, #tpu.memory_space<vmem>>, vector<1x8x1xf32>
    %113 = vector.shape_cast %112 : vector<1x8x1xf32> to vector<8x1xf32>
    %114 = vector.shape_cast %111 : vector<8x1xf32> to vector<1x8x1xf32>
    tpu.vector_store %arg9[%c2_77, %c0_78, %c0_79], %114 {strides = array<i32>} : memref<4x8x1xf32, #tpu.memory_space<vmem>>, vector<1x8x1xf32>,
    %c0_80 = arith.constant 0 : index
    %c16_81 = arith.constant 16 : index
    %115 = vector.load %arg10[%c0_80, %c16_81] : memref<8x32xf32, #tpu.memory_space<vmem>>, vector<8x8xf32>
    %116 = vector.broadcast %102 : vector<8x1xf32> to vector<8x8xf32>
    %117 = arith.mulf %116, %115 : vector<8x8xf32>
    %118 = arith.truncf %105 : vector<8x8xf32> to vector<8x8xbf16>
    %cst_82 = arith.constant dense<0.000000e+00> : vector<8x8xf32>
    %119 = tpu.matmul %118, %90, %cst_82 {dimension_numbers = #tpu.dot_dimension_numbers<[1], [0], [0], [1], [0, 0, 1, 1], [], []>} : vector<8x8xbf16>, vector<8x8xbf16>, vector<8x8xf32> -> vector<8x8xf32>
    %120 = arith.addf %117, %119 : vector<8x8xf32>
    %c0_83 = arith.constant 0 : index
    %c16_84 = arith.constant 16 : index
    %121 = vector.load %arg10[%c0_83, %c16_84] : memref<8x32xf32, #tpu.memory_space<vmem>>, vector<8x8xf32>
    tpu.vector_store %arg10[%c0_83, %c16_84], %120 {strides = array<i32>} : memref<8x32xf32, #tpu.memory_space<vmem>>, vector<8x8xf32>,
    %c2_85 = arith.constant 2 : index
    %c0_86 = arith.constant 0 : index
    %c0_87 = arith.constant 0 : index
    %122 = vector.load %arg8[%c2_85, %c0_86, %c0_87] : memref<4x8x1xf32, #tpu.memory_space<vmem>>, vector<1x8x1xf32>
    %123 = vector.shape_cast %122 : vector<1x8x1xf32> to vector<8x1xf32>
    %124 = vector.shape_cast %100 : vector<8x1xf32> to vector<1x8x1xf32>
    tpu.vector_store %arg8[%c2_85, %c0_86, %c0_87], %124 {strides = array<i32>} : memref<4x8x1xf32, #tpu.memory_space<vmem>>, vector<1x8x1xf32>,
    %c0_88 = arith.constant 0 : index
    %c0_89 = arith.constant 0 : index
    %c24 = arith.constant 24 : index
    %125 = vector.load %arg4[%c0_88, %c0_89, %c24] : memref<1x8x32xbf16, #tpu.memory_space<vmem>>, vector<1x8x8xbf16>
    %126 = vector.shape_cast %125 : vector<1x8x8xbf16> to vector<8x8xbf16>
    %c0_90 = arith.constant 0 : index
    %c0_91 = arith.constant 0 : index
    %c24_92 = arith.constant 24 : index
    %127 = vector.load %arg5[%c0_90, %c0_91, %c24_92] : memref<1x8x32xbf16, #tpu.memory_space<vmem>>, vector<1x8x8xbf16>
    %128 = vector.shape_cast %127 : vector<1x8x8xbf16> to vector<8x8xbf16>
    %c0_93 = arith.constant 0 : index
    %c0_94 = arith.constant 0 : index
    %c24_95 = arith.constant 24 : index
    %129 = vector.load %arg6[%c0_93, %c0_94, %c24_95] : memref<1x8x32xbf16, #tpu.memory_space<vmem>>, vector<1x8x8xbf16>
    %130 = vector.shape_cast %129 : vector<1x8x8xbf16> to vector<8x8xbf16>
    %cst_96 = arith.constant dense<0.000000e+00> : vector<8x8xf32>
    %131 = tpu.matmul %126, %128, %cst_96 {dimension_numbers = #tpu.dot_dimension_numbers<[1], [1], [0], [0], [0, 0, 1, 0], [], []>} : vector<8x8xbf16>, vector<8x8xbf16>, vector<8x8xf32> -> vector<8x8xf32>
    %cst_97 = arith.constant 0.353553385 : f32
    %132 = vector.broadcast %cst_97 : f32 to vector<8x8xf32>
    %133 = arith.mulf %131, %132 : vector<8x8xf32>
    %134 = vector.broadcast %4 : vector<1x8xf32> to vector<8x8xf32>
    %135 = arith.addf %133, %134 : vector<8x8xf32>
    %c3 = arith.constant 3 : index
    %c0_98 = arith.constant 0 : index
    %c0_99 = arith.constant 0 : index
    %136 = vector.load %arg8[%c3, %c0_98, %c0_99] : memref<4x8x1xf32, #tpu.memory_space<vmem>>, vector<1x8x1xf32>
    %137 = vector.shape_cast %136 : vector<1x8x1xf32> to vector<8x1xf32>
    %cst_100 = arith.constant dense<0xFF800000> : vector<8xf32>
    %138 = vector.multi_reduction <maximumf>, %135, %cst_100 [1] : vector<8x8xf32> to vector<8xf32>
    %139 = vector.shape_cast %138 : vector<8xf32> to vector<8x1xf32>
    %140 = arith.maximumf %137, %139 : vector<8x1xf32>
    %141 = arith.subf %137, %140 : vector<8x1xf32>
    %142 = math.exp %141 : vector<8x1xf32>
    %143 = vector.broadcast %140 : vector<8x1xf32> to vector<8x8xf32>
    %144 = arith.subf %135, %143 : vector<8x8xf32>
    %145 = math.exp %144 : vector<8x8xf32>
    %c3_101 = arith.constant 3 : index
    %c0_102 = arith.constant 0 : index
    %c0_103 = arith.constant 0 : index
    %146 = vector.load %arg9[%c3_101, %c0_102, %c0_103] : memref<4x8x1xf32, #tpu.memory_space<vmem>>, vector<1x8x1xf32>
    %147 = vector.shape_cast %146 : vector<1x8x1xf32> to vector<8x1xf32>
    %148 = arith.mulf %142, %147 : vector<8x1xf32>
    %cst_104 = arith.constant dense<0.000000e+00> : vector<8xf32>
    %149 = vector.multi_reduction <add>, %145, %cst_104 [1] : vector<8x8xf32> to vector<8xf32>
    %150 = vector.shape_cast %149 : vector<8xf32> to vector<8x1xf32>
    %151 = arith.addf %148, %150 : vector<8x1xf32>
    %c3_105 = arith.constant 3 : index
    %c0_106 = arith.constant 0 : index
    %c0_107 = arith.constant 0 : index
    %152 = vector.load %arg9[%c3_105, %c0_106, %c0_107] : memref<4x8x1xf32, #tpu.memory_space<vmem>>, vector<1x8x1xf32>
    %153 = vector.shape_cast %152 : vector<1x8x1xf32> to vector<8x1xf32>
    %154 = vector.shape_cast %151 : vector<8x1xf32> to vector<1x8x1xf32>
    tpu.vector_store %arg9[%c3_105, %c0_106, %c0_107], %154 {strides = array<i32>} : memref<4x8x1xf32, #tpu.memory_space<vmem>>, vector<1x8x1xf32>,
    %c0_108 = arith.constant 0 : index
    %c24_109 = arith.constant 24 : index
    %155 = vector.load %arg10[%c0_108, %c24_109] : memref<8x32xf32, #tpu.memory_space<vmem>>, vector<8x8xf32>
    %156 = vector.broadcast %142 : vector<8x1xf32> to vector<8x8xf32>
    %157 = arith.mulf %156, %155 : vector<8x8xf32>
    %158 = arith.truncf %145 : vector<8x8xf32> to vector<8x8xbf16>
    %cst_110 = arith.constant dense<0.000000e+00> : vector<8x8xf32>
    %159 = tpu.matmul %158, %130, %cst_110 {dimension_numbers = #tpu.dot_dimension_numbers<[1], [0], [0], [1], [0, 0, 1, 1], [], []>} : vector<8x8xbf16>, vector<8x8xbf16>, vector<8x8xf32> -> vector<8x8xf32>
    %160 = arith.addf %157, %159 : vector<8x8xf32>
    %c0_111 = arith.constant 0 : index
    %c24_112 = arith.constant 24 : index
    %161 = vector.load %arg10[%c0_111, %c24_112] : memref<8x32xf32, #tpu.memory_space<vmem>>, vector<8x8xf32>
    tpu.vector_store %arg10[%c0_111, %c24_112], %160 {strides = array<i32>} : memref<8x32xf32, #tpu.memory_space<vmem>>, vector<8x8xf32>,
    %c3_113 = arith.constant 3 : index
    %c0_114 = arith.constant 0 : index
    %c0_115 = arith.constant 0 : index
    %162 = vector.load %arg8[%c3_113, %c0_114, %c0_115] : memref<4x8x1xf32, #tpu.memory_space<vmem>>, vector<1x8x1xf32>
    %163 = vector.shape_cast %162 : vector<1x8x1xf32> to vector<8x1xf32>
    %164 = vector.shape_cast %140 : vector<8x1xf32> to vector<1x8x1xf32>
    tpu.vector_store %arg8[%c3_113, %c0_114, %c0_115], %164 {strides = array<i32>} : memref<4x8x1xf32, #tpu.memory_space<vmem>>, vector<1x8x1xf32>,
    %c0_i32_116 = arith.constant 0 : i32
    %165 = arith.cmpi eq, %arg2, %c0_i32_116 : i32
    %166 = arith.extui %165 : i1 to i32
    %c0_i32_117 = arith.constant 0 : i32
    %167 = arith.cmpi ne, %166, %c0_i32_117 : i32
    scf.if %167 {
      %c0_118 = arith.constant 0 : index
      %c0_119 = arith.constant 0 : index
      %168 = vector.load %arg10[%c0_118, %c0_119] : memref<8x32xf32, #tpu.memory_space<vmem>>, vector<8x8xf32>
      %c0_120 = arith.constant 0 : index
      %c0_121 = arith.constant 0 : index
      %c0_122 = arith.constant 0 : index
      %169 = vector.load %arg9[%c0_120, %c0_121, %c0_122] : memref<4x8x1xf32, #tpu.memory_space<vmem>>, vector<1x8x1xf32>
      %170 = vector.shape_cast %169 : vector<1x8x1xf32> to vector<8x1xf32>
      %171 = tpu.reciprocal %170 {approx = true} : vector<8x1xf32> -> vector<8x1xf32>
      %172 = vector.broadcast %171 : vector<8x1xf32> to vector<8x8xf32>
      %173 = arith.mulf %168, %172 : vector<8x8xf32>
      %c0_123 = arith.constant 0 : index
      %c0_124 = arith.constant 0 : index
      %174 = vector.load %arg10[%c0_123, %c0_124] : memref<8x32xf32, #tpu.memory_space<vmem>>, vector<8x8xf32>
      tpu.vector_store %arg10[%c0_123, %c0_124], %173 {strides = array<i32>} : memref<8x32xf32, #tpu.memory_space<vmem>>, vector<8x8xf32>,
      %c0_125 = arith.constant 0 : index
      %c8_126 = arith.constant 8 : index
      %175 = vector.load %arg10[%c0_125, %c8_126] : memref<8x32xf32, #tpu.memory_space<vmem>>, vector<8x8xf32>
      %c1_127 = arith.constant 1 : index
      %c0_128 = arith.constant 0 : index
      %c0_129 = arith.constant 0 : index
      %176 = vector.load %arg9[%c1_127, %c0_128, %c0_129] : memref<4x8x1xf32, #tpu.memory_space<vmem>>, vector<1x8x1xf32>
      %177 = vector.shape_cast %176 : vector<1x8x1xf32> to vector<8x1xf32>
      %178 = tpu.reciprocal %177 {approx = true} : vector<8x1xf32> -> vector<8x1xf32>
      %179 = vector.broadcast %178 : vector<8x1xf32> to vector<8x8xf32>
      %180 = arith.mulf %175, %179 : vector<8x8xf32>
      %c0_130 = arith.constant 0 : index
      %c8_131 = arith.constant 8 : index
      %181 = vector.load %arg10[%c0_130, %c8_131] : memref<8x32xf32, #tpu.memory_space<vmem>>, vector<8x8xf32>
      tpu.vector_store %arg10[%c0_130, %c8_131], %180 {strides = array<i32>} : memref<8x32xf32, #tpu.memory_space<vmem>>, vector<8x8xf32>,
      %c0_132 = arith.constant 0 : index
      %c16_133 = arith.constant 16 : index
      %182 = vector.load %arg10[%c0_132, %c16_133] : memref<8x32xf32, #tpu.memory_space<vmem>>, vector<8x8xf32>
      %c2_134 = arith.constant 2 : index
      %c0_135 = arith.constant 0 : index
      %c0_136 = arith.constant 0 : index
      %183 = vector.load %arg9[%c2_134, %c0_135, %c0_136] : memref<4x8x1xf32, #tpu.memory_space<vmem>>, vector<1x8x1xf32>
      %184 = vector.shape_cast %183 : vector<1x8x1xf32> to vector<8x1xf32>
      %185 = tpu.reciprocal %184 {approx = true} : vector<8x1xf32> -> vector<8x1xf32>
      %186 = vector.broadcast %185 : vector<8x1xf32> to vector<8x8xf32>
      %187 = arith.mulf %182, %186 : vector<8x8xf32>
      %c0_137 = arith.constant 0 : index
      %c16_138 = arith.constant 16 : index
      %188 = vector.load %arg10[%c0_137, %c16_138] : memref<8x32xf32, #tpu.memory_space<vmem>>, vector<8x8xf32>
      tpu.vector_store %arg10[%c0_137, %c16_138], %187 {strides = array<i32>} : memref<8x32xf32, #tpu.memory_space<vmem>>, vector<8x8xf32>,
      %c0_139 = arith.constant 0 : index
      %c24_140 = arith.constant 24 : index
      %189 = vector.load %arg10[%c0_139, %c24_140] : memref<8x32xf32, #tpu.memory_space<vmem>>, vector<8x8xf32>
      %c3_141 = arith.constant 3 : index
      %c0_142 = arith.constant 0 : index
      %c0_143 = arith.constant 0 : index
      %190 = vector.load %arg9[%c3_141, %c0_142, %c0_143] : memref<4x8x1xf32, #tpu.memory_space<vmem>>, vector<1x8x1xf32>
      %191 = vector.shape_cast %190 : vector<1x8x1xf32> to vector<8x1xf32>
      %192 = tpu.reciprocal %191 {approx = true} : vector<8x1xf32> -> vector<8x1xf32>
      %193 = vector.broadcast %192 : vector<8x1xf32> to vector<8x8xf32>
      %194 = arith.mulf %189, %193 : vector<8x8xf32>
      %c0_144 = arith.constant 0 : index
      %c24_145 = arith.constant 24 : index
      %195 = vector.load %arg10[%c0_144, %c24_145] : memref<8x32xf32, #tpu.memory_space<vmem>>, vector<8x8xf32>
      tpu.vector_store %arg10[%c0_144, %c24_145], %194 {strides = array<i32>} : memref<8x32xf32, #tpu.memory_space<vmem>>, vector<8x8xf32>,
      %c0_146 = arith.constant 0 : index
      %c0_147 = arith.constant 0 : index
      %196 = vector.load %arg10[%c0_146, %c0_147] : memref<8x32xf32, #tpu.memory_space<vmem>>, vector<8x32xf32>
      %197 = arith.truncf %196 : vector<8x32xf32> to vector<8x32xbf16>
      %c0_148 = arith.constant 0 : index
      %c0_149 = arith.constant 0 : index
      %c0_150 = arith.constant 0 : index
      %198 = vector.load %arg7[%c0_148, %c0_149, %c0_150] : memref<1x8x32xbf16, #tpu.memory_space<vmem>>, vector<1x8x32xbf16>
      %199 = vector.shape_cast %198 : vector<1x8x32xbf16> to vector<8x32xbf16>
      %200 = vector.shape_cast %197 : vector<8x32xbf16> to vector<1x8x32xbf16>
      tpu.vector_store %arg7[%c0_148, %c0_149, %c0_150], %200 {strides = array<i32>} : memref<1x8x32xbf16, #tpu.memory_space<vmem>>, vector<1x8x32xbf16>,
    } else {
    }
    return
  }
  func.func @transform_0(%arg0: i32, %arg1: i32, %arg2: i32) -> (i32, i32, i32) {
    %c0_i32 = arith.constant 0 : i32
    %c0_i32_0 = arith.constant 0 : i32
    return %arg0, %c0_i32, %arg2 : i32, i32, i32
  }
  func.func @transform_1(%arg0: i32, %arg1: i32, %arg2: i32) -> (i32, i32, i32) {
    %c0_i32 = arith.constant 0 : i32
    %c0_i32_0 = arith.constant 0 : i32
    return %arg0, %arg1, %c0_i32 : i32, i32, i32
  }
  func.func @transform_2(%arg0: i32, %arg1: i32, %arg2: i32) -> (i32, i32, i32) {
    %c0_i32 = arith.constant 0 : i32
    %c0_i32_0 = arith.constant 0 : i32
    return %arg0, %arg2, %c0_i32 : i32, i32, i32
  }
  func.func @transform_3(%arg0: i32, %arg1: i32, %arg2: i32) -> (i32, i32, i32) {
    %c0_i32 = arith.constant 0 : i32
    %c0_i32_0 = arith.constant 0 : i32
    return %arg0, %arg2, %c0_i32 : i32, i32, i32
  }
  func.func @transform_4(%arg0: i32, %arg1: i32, %arg2: i32) -> (i32, i32, i32) {
    %c0_i32 = arith.constant 0 : i32
    %c0_i32_0 = arith.constant 0 : i32
    return %arg0, %arg1, %c0_i32 : i32, i32, i32
  }
}

module attributes {stable_mosaic.version = 11 : i64} {
  func.func @_linear_kernel(%arg0: i32, %arg1: i32, %arg2: i32, %arg3: memref<16x32xbf16, #tpu.memory_space<vmem>>, %arg4: memref<32x128xbf16, #tpu.memory_space<vmem>>, %arg5: memref<1x128xf32, #tpu.memory_space<vmem>>, %arg6: memref<16x128xbf16, #tpu.memory_space<vmem>>, %arg7: memref<16x128xf32, #tpu.memory_space<vmem>>) attributes {dimension_semantics = [#tpu.dimension_semantics<parallel>, #tpu.dimension_semantics<parallel>, #tpu.dimension_semantics<arbitrary>], iteration_bounds = array<i64: 1, 1, 1>, scalar_prefetch = 0 : i64, scratch_operands = 1 : i64, tpu.core_type = #tpu.core_type<tc>, window_params = [{transform_indices = @transform_0, window_bounds = array<i64: 16, 32>}, {transform_indices = @transform_1, window_bounds = array<i64: 32, 128>}, {transform_indices = @transform_2, window_bounds = array<i64: 1, 128>}, {transform_indices = @transform_3, window_bounds = array<i64: 16, 128>}]} {
    %c0_i32 = arith.constant 0 : i32
    %0 = arith.cmpi eq, %arg2, %c0_i32 : i32
    %1 = arith.extui %0 : i1 to i32
    %c0_i32_0 = arith.constant 0 : i32
    %2 = arith.cmpi ne, %1, %c0_i32_0 : i32
    scf.if %2 {
      %cst_10 = arith.constant 0.000000e+00 : f32
      %12 = vector.broadcast %cst_10 : f32 to vector<16x128xf32>
      %c0_11 = arith.constant 0 : index
      %c0_12 = arith.constant 0 : index
      %13 = vector.load %arg7[%c0_11, %c0_12] : memref<16x128xf32, #tpu.memory_space<vmem>>, vector<16x128xf32>
      tpu.vector_store %arg7[%c0_11, %c0_12], %12 {strides = array<i32>} : memref<16x128xf32, #tpu.memory_space<vmem>>, vector<16x128xf32>,
    } else {
    }
    %c0 = arith.constant 0 : index
    %c0_1 = arith.constant 0 : index
    %3 = vector.load %arg7[%c0, %c0_1] : memref<16x128xf32, #tpu.memory_space<vmem>>, vector<16x128xf32>
    %c0_2 = arith.constant 0 : index
    %c0_3 = arith.constant 0 : index
    %4 = vector.load %arg3[%c0_2, %c0_3] : memref<16x32xbf16, #tpu.memory_space<vmem>>, vector<16x32xbf16>
    %c0_4 = arith.constant 0 : index
    %c0_5 = arith.constant 0 : index
    %5 = vector.load %arg4[%c0_4, %c0_5] : memref<32x128xbf16, #tpu.memory_space<vmem>>, vector<32x128xbf16>
    %cst = arith.constant dense<0.000000e+00> : vector<16x128xf32>
    %6 = tpu.matmul %4, %5, %cst {dimension_numbers = #tpu.dot_dimension_numbers<[1], [0], [0], [1], [0, 0, 1, 1], [], []>} : vector<16x32xbf16>, vector<32x128xbf16>, vector<16x128xf32> -> vector<16x128xf32>
    %7 = arith.addf %3, %6 : vector<16x128xf32>
    %c0_6 = arith.constant 0 : index
    %c0_7 = arith.constant 0 : index
    %8 = vector.load %arg7[%c0_6, %c0_7] : memref<16x128xf32, #tpu.memory_space<vmem>>, vector<16x128xf32>
    tpu.vector_store %arg7[%c0_6, %c0_7], %7 {strides = array<i32>} : memref<16x128xf32, #tpu.memory_space<vmem>>, vector<16x128xf32>,
    %c0_i32_8 = arith.constant 0 : i32
    %9 = arith.cmpi eq, %arg2, %c0_i32_8 : i32
    %10 = arith.extui %9 : i1 to i32
    %c0_i32_9 = arith.constant 0 : i32
    %11 = arith.cmpi ne, %10, %c0_i32_9 : i32
    scf.if %11 {
      %c0_10 = arith.constant 0 : index
      %c0_11 = arith.constant 0 : index
      %12 = vector.load %arg7[%c0_10, %c0_11] : memref<16x128xf32, #tpu.memory_space<vmem>>, vector<16x128xf32>
      %c0_12 = arith.constant 0 : index
      %c0_13 = arith.constant 0 : index
      %13 = vector.load %arg5[%c0_12, %c0_13] : memref<1x128xf32, #tpu.memory_space<vmem>>, vector<1x128xf32>
      %14 = vector.broadcast %13 : vector<1x128xf32> to vector<16x128xf32>
      %15 = arith.addf %12, %14 : vector<16x128xf32>
      %cst_14 = arith.constant 5.000000e-01 : f32
      %16 = vector.broadcast %cst_14 : f32 to vector<16x128xf32>
      %17 = arith.mulf %16, %15 : vector<16x128xf32>
      %cst_15 = arith.constant 4.471500e-02 : f32
      %18 = vector.broadcast %cst_15 : f32 to vector<16x128xf32>
      %19 = arith.mulf %18, %15 : vector<16x128xf32>
      %20 = arith.mulf %19, %15 : vector<16x128xf32>
      %21 = arith.mulf %20, %15 : vector<16x128xf32>
      %22 = arith.addf %15, %21 : vector<16x128xf32>
      %cst_16 = arith.constant 0.797884583 : f32
      %23 = vector.broadcast %cst_16 : f32 to vector<16x128xf32>
      %24 = arith.mulf %23, %22 : vector<16x128xf32>
      %25 = math.tanh %24 : vector<16x128xf32>
      %cst_17 = arith.constant 1.000000e+00 : f32
      %26 = vector.broadcast %cst_17 : f32 to vector<16x128xf32>
      %27 = arith.addf %26, %25 : vector<16x128xf32>
      %28 = arith.mulf %17, %27 : vector<16x128xf32>
      %29 = arith.truncf %28 : vector<16x128xf32> to vector<16x128xbf16>
      %c0_18 = arith.constant 0 : index
      %c0_19 = arith.constant 0 : index
      %30 = vector.load %arg6[%c0_18, %c0_19] : memref<16x128xbf16, #tpu.memory_space<vmem>>, vector<16x128xbf16>
      tpu.vector_store %arg6[%c0_18, %c0_19], %29 {strides = array<i32>} : memref<16x128xbf16, #tpu.memory_space<vmem>>, vector<16x128xbf16>,
    } else {
    }
    return
  }
  func.func @transform_0(%arg0: i32, %arg1: i32, %arg2: i32) -> (i32, i32) {
    %c0_i32 = arith.constant 0 : i32
    return %arg0, %arg2 : i32, i32
  }
  func.func @transform_1(%arg0: i32, %arg1: i32, %arg2: i32) -> (i32, i32) {
    %c0_i32 = arith.constant 0 : i32
    return %arg2, %arg1 : i32, i32
  }
  func.func @transform_2(%arg0: i32, %arg1: i32, %arg2: i32) -> (i32, i32) {
    %c0_i32 = arith.constant 0 : i32
    %c0_i32_0 = arith.constant 0 : i32
    return %c0_i32, %arg1 : i32, i32
  }
  func.func @transform_3(%arg0: i32, %arg1: i32, %arg2: i32) -> (i32, i32) {
    %c0_i32 = arith.constant 0 : i32
    return %arg0, %arg1 : i32, i32
  }
}

module attributes {stable_mosaic.version = 11 : i64} {
  func.func @_linear_kernel(%arg0: i32, %arg1: i32, %arg2: i32, %arg3: memref<16x128xbf16, #tpu.memory_space<vmem>>, %arg4: memref<128x32xbf16, #tpu.memory_space<vmem>>, %arg5: memref<1x32xf32, #tpu.memory_space<vmem>>, %arg6: memref<16x32xbf16, #tpu.memory_space<vmem>>, %arg7: memref<16x32xf32, #tpu.memory_space<vmem>>) attributes {dimension_semantics = [#tpu.dimension_semantics<parallel>, #tpu.dimension_semantics<parallel>, #tpu.dimension_semantics<arbitrary>], iteration_bounds = array<i64: 1, 1, 1>, scalar_prefetch = 0 : i64, scratch_operands = 1 : i64, tpu.core_type = #tpu.core_type<tc>, window_params = [{transform_indices = @transform_0, window_bounds = array<i64: 16, 128>}, {transform_indices = @transform_1, window_bounds = array<i64: 128, 32>}, {transform_indices = @transform_2, window_bounds = array<i64: 1, 32>}, {transform_indices = @transform_3, window_bounds = array<i64: 16, 32>}]} {
    %c0_i32 = arith.constant 0 : i32
    %0 = arith.cmpi eq, %arg2, %c0_i32 : i32
    %1 = arith.extui %0 : i1 to i32
    %c0_i32_0 = arith.constant 0 : i32
    %2 = arith.cmpi ne, %1, %c0_i32_0 : i32
    scf.if %2 {
      %cst_10 = arith.constant 0.000000e+00 : f32
      %12 = vector.broadcast %cst_10 : f32 to vector<16x32xf32>
      %c0_11 = arith.constant 0 : index
      %c0_12 = arith.constant 0 : index
      %13 = vector.load %arg7[%c0_11, %c0_12] : memref<16x32xf32, #tpu.memory_space<vmem>>, vector<16x32xf32>
      tpu.vector_store %arg7[%c0_11, %c0_12], %12 {strides = array<i32>} : memref<16x32xf32, #tpu.memory_space<vmem>>, vector<16x32xf32>,
    } else {
    }
    %c0 = arith.constant 0 : index
    %c0_1 = arith.constant 0 : index
    %3 = vector.load %arg7[%c0, %c0_1] : memref<16x32xf32, #tpu.memory_space<vmem>>, vector<16x32xf32>
    %c0_2 = arith.constant 0 : index
    %c0_3 = arith.constant 0 : index
    %4 = vector.load %arg3[%c0_2, %c0_3] : memref<16x128xbf16, #tpu.memory_space<vmem>>, vector<16x128xbf16>
    %c0_4 = arith.constant 0 : index
    %c0_5 = arith.constant 0 : index
    %5 = vector.load %arg4[%c0_4, %c0_5] : memref<128x32xbf16, #tpu.memory_space<vmem>>, vector<128x32xbf16>
    %cst = arith.constant dense<0.000000e+00> : vector<16x32xf32>
    %6 = tpu.matmul %4, %5, %cst {dimension_numbers = #tpu.dot_dimension_numbers<[1], [0], [0], [1], [0, 0, 1, 1], [], []>} : vector<16x128xbf16>, vector<128x32xbf16>, vector<16x32xf32> -> vector<16x32xf32>
    %7 = arith.addf %3, %6 : vector<16x32xf32>
    %c0_6 = arith.constant 0 : index
    %c0_7 = arith.constant 0 : index
    %8 = vector.load %arg7[%c0_6, %c0_7] : memref<16x32xf32, #tpu.memory_space<vmem>>, vector<16x32xf32>
    tpu.vector_store %arg7[%c0_6, %c0_7], %7 {strides = array<i32>} : memref<16x32xf32, #tpu.memory_space<vmem>>, vector<16x32xf32>,
    %c0_i32_8 = arith.constant 0 : i32
    %9 = arith.cmpi eq, %arg2, %c0_i32_8 : i32
    %10 = arith.extui %9 : i1 to i32
    %c0_i32_9 = arith.constant 0 : i32
    %11 = arith.cmpi ne, %10, %c0_i32_9 : i32
    scf.if %11 {
      %c0_10 = arith.constant 0 : index
      %c0_11 = arith.constant 0 : index
      %12 = vector.load %arg7[%c0_10, %c0_11] : memref<16x32xf32, #tpu.memory_space<vmem>>, vector<16x32xf32>
      %c0_12 = arith.constant 0 : index
      %c0_13 = arith.constant 0 : index
      %13 = vector.load %arg5[%c0_12, %c0_13] : memref<1x32xf32, #tpu.memory_space<vmem>>, vector<1x32xf32>
      %14 = vector.broadcast %13 : vector<1x32xf32> to vector<16x32xf32>
      %15 = arith.addf %12, %14 : vector<16x32xf32>
      %16 = arith.truncf %15 : vector<16x32xf32> to vector<16x32xbf16>
      %c0_14 = arith.constant 0 : index
      %c0_15 = arith.constant 0 : index
      %17 = vector.load %arg6[%c0_14, %c0_15] : memref<16x32xbf16, #tpu.memory_space<vmem>>, vector<16x32xbf16>
      tpu.vector_store %arg6[%c0_14, %c0_15], %16 {strides = array<i32>} : memref<16x32xbf16, #tpu.memory_space<vmem>>, vector<16x32xbf16>,
    } else {
    }
    return
  }
  func.func @transform_0(%arg0: i32, %arg1: i32, %arg2: i32) -> (i32, i32) {
    %c0_i32 = arith.constant 0 : i32
    return %arg0, %arg2 : i32, i32
  }
  func.func @transform_1(%arg0: i32, %arg1: i32, %arg2: i32) -> (i32, i32) {
    %c0_i32 = arith.constant 0 : i32
    return %arg2, %arg1 : i32, i32
  }
  func.func @transform_2(%arg0: i32, %arg1: i32, %arg2: i32) -> (i32, i32) {
    %c0_i32 = arith.constant 0 : i32
    %c0_i32_0 = arith.constant 0 : i32
    return %c0_i32, %arg1 : i32, i32
  }
  func.func @transform_3(%arg0: i32, %arg1: i32, %arg2: i32) -> (i32, i32) {
    %c0_i32 = arith.constant 0 : i32
    return %arg0, %arg1 : i32, i32
  }
}

module attributes {stable_mosaic.version = 11 : i64} {
  func.func @_score_kernel(%arg0: i32, %arg1: memref<2x16xbf16, #tpu.memory_space<vmem>>, %arg2: memref<48x16xbf16, #tpu.memory_space<vmem>>, %arg3: memref<2x48xf32, #tpu.memory_space<vmem>>) attributes {dimension_semantics = [#tpu.dimension_semantics<parallel>], iteration_bounds = array<i64: 1>, scalar_prefetch = 0 : i64, scratch_operands = 0 : i64, tpu.core_type = #tpu.core_type<tc>, window_params = [{pipeline_mode = #tpu.pipeline_mode<synchronous>, transform_indices = @transform_0, window_bounds = array<i64: 2, 16>}, {transform_indices = @transform_1, window_bounds = array<i64: 48, 16>}, {transform_indices = @transform_2, window_bounds = array<i64: 2, 48>}]} {
    %c0 = arith.constant 0 : index
    %c0_0 = arith.constant 0 : index
    %0 = vector.load %arg1[%c0, %c0_0] : memref<2x16xbf16, #tpu.memory_space<vmem>>, vector<2x16xbf16>
    %c0_1 = arith.constant 0 : index
    %c0_2 = arith.constant 0 : index
    %1 = vector.load %arg2[%c0_1, %c0_2] : memref<48x16xbf16, #tpu.memory_space<vmem>>, vector<48x16xbf16>
    %cst = arith.constant dense<0.000000e+00> : vector<2x48xf32>
    %2 = tpu.matmul %0, %1, %cst {dimension_numbers = #tpu.dot_dimension_numbers<[1], [1], [0], [0], [0, 0, 1, 0], [], []>} : vector<2x16xbf16>, vector<48x16xbf16>, vector<2x48xf32> -> vector<2x48xf32>
    %c0_3 = arith.constant 0 : index
    %c0_4 = arith.constant 0 : index
    %3 = vector.load %arg3[%c0_3, %c0_4] : memref<2x48xf32, #tpu.memory_space<vmem>>, vector<2x48xf32>
    tpu.vector_store %arg3[%c0_3, %c0_4], %2 {strides = array<i32>} : memref<2x48xf32, #tpu.memory_space<vmem>>, vector<2x48xf32>,
    return
  }
  func.func @transform_0(%arg0: i32) -> (i32, i32) {
    %c0_i32 = arith.constant 0 : i32
    %c0_i32_0 = arith.constant 0 : i32
    %c0_i32_1 = arith.constant 0 : i32
    return %c0_i32, %c0_i32_0 : i32, i32
  }
  func.func @transform_1(%arg0: i32) -> (i32, i32) {
    %c0_i32 = arith.constant 0 : i32
    %c0_i32_0 = arith.constant 0 : i32
    return %arg0, %c0_i32 : i32, i32
  }
  func.func @transform_2(%arg0: i32) -> (i32, i32) {
    %c0_i32 = arith.constant 0 : i32
    %c0_i32_0 = arith.constant 0 : i32
    return %c0_i32, %arg0 : i32, i32
  }
}

</mosaic_0001>

<bundles_post_ra>
// kernel: _lambda_.14
= control target key start
LH: loop header
LB: loop body
LE: loop exit
PB: predicated region body
PF: predicated region fallthrough
CT: control target
= control target key end

     0   :  { %v175_v0 = vmov 0.0   ;;  %vm176_vm0 = vmmov 0   ;;  %vm46_vm1 = vcmask 261120   ;;  %s212_s1 = inlined_call_operand.vmem [shape: bf16[32,128], index: 1, kind: input, shape index: {}]   ;;  %s213_s0 = inlined_call_operand.vmem [shape: bf16[16,32], index: 0, kind: input, shape index: {}]   ;;  %s214_s2 = inlined_call_operand.vmem [shape: f32[1,128], index: 2, kind: input, shape index: {}]   ;;  %s215_s3 = inlined_call_operand.vmem [shape: bf16[16,128], index: 3, kind: output, shape index: {}]  }
   0x1   :  { %158 = vmatprep.subr.bf16.mxu0 %v175_v0  ;;  %v168_v1 = vld [vmem:[%s212_s1 + $0x8] sm:$0xff]   ;;  %162 = vmatprep.mubr.msk.bf16.mxu0 %vm176_vm0, %v175_v0  ;;  %v169_v2 = vld [vmem:[%s212_s1] sm:$0xff]  }
   0x2   :  { %159 = vmatpush3.bf16.msra.mxu0 %v168_v1  ;;  %v170_v3 = vld [vmem:[%s213_s0] sm:$0xff]  }
   0x3   :  { %160 = vmatprep.subr.bf16.mxu0 %v175_v0  ;;  %v145_v4 = vld [vmem:[%s214_s2] ss:$0 sm:$0xff] }
   0x6   :  { %161 = vmatpush3.bf16.msra.mxu0 %v169_v2 }
   0x9   :  { %163 = vmatmul.mubr.msk.bf16.vlgmr.msra.gmra.mxu0 %vm46_vm1, %v170_v3 }
  0xc9   :  { %v84_v5 = vpop.f32.mrf.mxu0 }
  0xca   :  { %v107_v6 = vadd.f32 %v145_v4, %v84_v5 }
  0xcb   :  { %v164_v7 = vpop.f32.mrf.mxu0 }
  0xcc   :  { %v111_v8 = vmul.f32 0.044715, %v107_v6  ;;  %v109_v24 = vmul.f32 0.5, %v107_v6 }
  0xcd   :  { %v87_v9 = vpop.f32.mrf.mxu0 }
  0xce   :  { %v113_v10 = vmul.f32 %v111_v8, %v107_v6  ;;  %v108_v11 = vadd.f32 %v145_v4, %v87_v9 }
  0xcf   :  { %v165_v12 = vpop.f32.mrf.mxu0 }
  0xd0   :  { %v115_v13 = vmul.f32 %v113_v10, %v107_v6  ;;  %v112_v14 = vmul.f32 0.044715, %v108_v11  ;;  %v110_v25 = vmul.f32 0.5, %v108_v11 }
  0xd2   :  { %v117_v15 = vadd.f32 %v115_v13, %v107_v6  ;;  %v114_v16 = vmul.f32 %v112_v14, %v108_v11 }
  0xd4   :  { %v119_v17 = vmul.f32 0.7978846, %v117_v15  ;;  %v116_v18 = vmul.f32 %v114_v16, %v108_v11 }
  0xd6   :  { %171 = vtanh.f32 %v119_v17  ;;  %v118_v19 = vadd.f32 %v116_v18, %v108_v11 }
  0xd8   :  { %v120_v20 = vmul.f32 0.7978846, %v118_v19 }
  0xda   :  { %173 = vtanh.f32 %v120_v20 }
  0xe3   :  { %v172_v21 = vpop.eup %171 }
  0xe4   :  { %v123_v22 = vadd.f32 1.0, %v172_v21 }
  0xe6   :  { %v125_v27 = vmul.f32 %v123_v22, %v109_v24 }
  0xe7   :  { %v174_v23 = vpop.eup %173 }
  0xe8   :  { %v124_v26 = vadd.f32 1.0, %v174_v23 }
  0xea   :  { %v126_v28 = vmul.f32 %v124_v26, %v110_v25 }
  0xec   :  { %v153_v29 = vpack.c.bf16 %v126_v28, %v125_v27 }
  0xee   :  { %154 = vst [vmem:[%s215_s3] sm:$0xff] %v153_v29  }

// kernel: _lambda_.13
= control target key start
LH: loop header
LB: loop body
LE: loop exit
PB: predicated region body
PF: predicated region fallthrough
CT: control target
= control target key end

     0   :  { %vm19_vm0 = vcmask 261120   ;;  %v150_v0 = vmov 0.0   ;;  %vm151_vm1 = vmmov 0   ;;  %vm118_vm2 = vcmask 257024   ;;  %s195_s1 = inlined_call_operand.vmem [shape: bf16[32,32], index: 1, kind: input, shape index: {}]   ;;  %s196_s0 = inlined_call_operand.vmem [shape: bf16[16,32], index: 0, kind: input, shape index: {}]   ;;  %s197_s2 = inlined_call_operand.vmem [shape: f32[1,32], index: 2, kind: input, shape index: {}]   ;;  %s198_s3 = inlined_call_operand.vmem [shape: bf16[16,32], index: 3, kind: output, shape index: {}]  }
   0x1   :  { %137 = vmatprep.subr.bf16.mxu0 %v150_v0  ;;  %v147_v1 = vld [vmem:[%s195_s1 + $0x8] sm:$0xff]   ;;  %141 = vmatprep.mubr.msk.bf16.mxu0 %vm151_vm1, %v150_v0  ;;  %20 = vst.msk [vmem:[#allocation2] sm:$0xff] %vm19_vm0, %v150_v0  ;;  %21 = vst.msk [vmem:[#allocation2 + $0x8] sm:$0xff] %vm19_vm0, %v150_v0  ;;  %v148_v2 = vld [vmem:[%s195_s1] sm:$0xff]  }
   0x2   :  { %138 = vmatpush3.bf16.msra.mxu0 %v147_v1  ;;  %v149_v3 = vld [vmem:[%s196_s0] sm:$0xff]  }
   0x3   :  { %139 = vmatprep.subr.bf16.mxu0 %v150_v0  ;;  %v129_v12 = vld [vmem:[%s197_s2] ss:$0 sm:$0xff] }
   0x6   :  { %140 = vmatpush3.bf16.msra.mxu0 %v148_v2 }
   0x8   :  { %v22_v4 = vld [vmem:[#allocation2] sm:$0xff]  ;;  %v23_v8 = vld [vmem:[#allocation2 + $0x8] sm:$0xff] }
   0x9   :  { %142 = vmatmul.mubr.msk.bf16.vlgmr.msra.gmra.mxu0 %vm19_vm0, %v149_v3 }
  0xc9   :  { %v85_v5 = vpop.f32.mrf.mxu0 }
  0xca   :  { %v92_v6 = vadd.f32 %v85_v5, %v22_v4 }
  0xcb   :  { %v143_v7 = vpop.f32.mrf.mxu0 }
  0xcc   :  { %94 = vst.msk [vmem:[#allocation2] sm:$0xff] %vm19_vm0, %v92_v6 }
  0xcd   :  { %v88_v9 = vpop.f32.mrf.mxu0 }
  0xce   :  { %v93_v10 = vadd.f32 %v88_v9, %v23_v8 }
  0xcf   :  { %v144_v11 = vpop.f32.mrf.mxu0 }
  0xd0   :  { %95 = vst.msk [vmem:[#allocation2 + $0x8] sm:$0xff] %vm19_vm0, %v93_v10 }
  0xd3   :  { %v99_v13 = vld [vmem:[#allocation2] sm:$0xff] }
  0xd4   :  { %v108_v14 = vadd.f32 %v129_v12, %v99_v13 }
  0xd6   :  { %v132_v15 = vpack.c.bf16 %v108_v14, %v108_v14 }
  0xd7   :  { %v100_v16 = vld [vmem:[#allocation2 + $0x8] sm:$0xff] }
  0xd8   :  { %119 = vst.msk [vmem:[%s198_s3] sm:$0xf] %vm118_vm2, %v132_v15  ;;  %v109_v17 = vadd.f32 %v129_v12, %v100_v16 }
  0xda   :  { %v133_v18 = vpack.c.bf16 %v109_v17, %v109_v17 }
  0xdc   :  { %120 = vst.msk [vmem:[%s198_s3 + $0x4] sm:$0xf] %vm118_vm2, %v133_v18 }

// kernel: _lambda_.11
= control target key start
LH: loop header
LB: loop body
LE: loop exit
PB: predicated region body
PF: predicated region fallthrough
CT: control target
= control target key end

     0   :  { %vm19_vm0 = vcmask 785408   ;;  %v151_v0 = vmov 0.0   ;;  %vm152_vm1 = vmmov 0   ;;  %vm47_vm2 = vcmask 261120   ;;  %s195_s1 = inlined_call_operand.vmem [shape: bf16[32,96], index: 1, kind: input, shape index: {}]   ;;  %s196_s0 = inlined_call_operand.vmem [shape: bf16[16,32], index: 0, kind: input, shape index: {}]   ;;  %s197_s2 = inlined_call_operand.vmem [shape: f32[1,96], index: 2, kind: input, shape index: {}]   ;;  %s198_s3 = inlined_call_operand.vmem [shape: bf16[16,96], index: 3, kind: output, shape index: {}]  }
   0x1   :  { %138 = vmatprep.subr.bf16.mxu0 %v151_v0  ;;  %v148_v1 = vld [vmem:[%s195_s1 + $0x8] sm:$0xff]   ;;  %142 = vmatprep.mubr.msk.bf16.mxu0 %vm152_vm1, %v151_v0  ;;  %20 = vst.msk [vmem:[#allocation2] sm:$0xff] %vm19_vm0, %v151_v0  ;;  %21 = vst.msk [vmem:[#allocation2 + $0x8] sm:$0xff] %vm19_vm0, %v151_v0  ;;  %v149_v2 = vld [vmem:[%s195_s1] sm:$0xff]   ;;  %vm119_vm3 = vcmask 781312  }
   0x2   :  { %139 = vmatpush3.bf16.msra.mxu0 %v148_v1  ;;  %v150_v3 = vld [vmem:[%s196_s0] sm:$0xff]  }
   0x3   :  { %140 = vmatprep.subr.bf16.mxu0 %v151_v0  ;;  %v130_v12 = vld [vmem:[%s197_s2] ss:$0 sm:$0xff] }
   0x6   :  { %141 = vmatpush3.bf16.msra.mxu0 %v149_v2 }
   0x8   :  { %v22_v4 = vld [vmem:[#allocation2] sm:$0xff]  ;;  %v23_v8 = vld [vmem:[#allocation2 + $0x8] sm:$0xff] }
   0x9   :  { %143 = vmatmul.mubr.msk.bf16.vlgmr.msra.gmra.mxu0 %vm47_vm2, %v150_v3 }
  0xc9   :  { %v85_v5 = vpop.f32.mrf.mxu0 }
  0xca   :  { %v92_v6 = vadd.f32 %v85_v5, %v22_v4 }
  0xcb   :  { %v144_v7 = vpop.f32.mrf.mxu0 }
  0xcc   :  { %95 = vst.msk [vmem:[#allocation2] sm:$0xff] %vm19_vm0, %v92_v6 }
  0xcd   :  { %v88_v9 = vpop.f32.mrf.mxu0 }
  0xce   :  { %v93_v10 = vadd.f32 %v88_v9, %v23_v8 }
  0xcf   :  { %v145_v11 = vpop.f32.mrf.mxu0 }
  0xd0   :  { %96 = vst.msk [vmem:[#allocation2 + $0x8] sm:$0xff] %vm19_vm0, %v93_v10 }
  0xd3   :  { %v100_v13 = vld [vmem:[#allocation2] sm:$0xff] }
  0xd4   :  { %v109_v14 = vadd.f32 %v130_v12, %v100_v13 }
  0xd6   :  { %v133_v15 = vpack.c.bf16 %v109_v14, %v109_v14 }
  0xd7   :  { %v101_v16 = vld [vmem:[#allocation2 + $0x8] sm:$0xff] }
  0xd8   :  { %120 = vst.msk [vmem:[%s198_s3] sm:$0xf] %vm119_vm3, %v133_v15  ;;  %v110_v17 = vadd.f32 %v130_v12, %v101_v16 }
  0xda   :  { %v134_v18 = vpack.c.bf16 %v110_v17, %v110_v17 }
  0xdc   :  { %121 = vst.msk [vmem:[%s198_s3 + $0x4] sm:$0xf] %vm119_vm3, %v134_v18 }

// kernel: neg.1
= control target key start
LH: loop header
LB: loop body
LE: loop exit
PB: predicated region body
PF: predicated region fallthrough
CT: control target
= control target key end

     0   :  { %s24_s0 = inlined_call_operand.vmem [shape: f32[2,48], index: 0, kind: input, shape index: {}]   ;;  %s25_s1 = inlined_call_operand.vmem [shape: f32[2,48], index: 1, kind: output, shape index: {}]  }
   0x1   :  { %v2_v0 = vld [vmem:[%s24_s0] sm:$0x3] }
   0x2   :  { %v5_v1 = vxor.u32 2147483648, %v2_v0 }
   0x4   :  { %7 = vst [vmem:[%s25_s1] sm:$0x3] %v5_v1 }

// kernel: _lambda_.12
= control target key start
LH: loop header
LB: loop body
LE: loop exit
PB: predicated region body
PF: predicated region fallthrough
CT: control target
= control target key end

     0   :  { %s1315_s15 = smov 0   ;;  %s1317_s16 = smov 0   ;;  %s1521_s0 = inlined_call_operand.vmem [shape: f32[2,1,8], index: 0, kind: input, shape index: {}]   ;;  %s1522_s1 = inlined_call_operand.vmem [shape: bf16[2,8,32], index: 1, kind: input, shape index: {}]   ;;  %s1523_s2 = inlined_call_operand.vmem [shape: bf16[2,8,32], index: 2, kind: input, shape index: {}]   ;;  %s1524_s3 = inlined_call_operand.vmem [shape: bf16[2,8,32], index: 3, kind: input, shape index: {}]   ;;  %s1525_s4 = inlined_call_operand.vmem [shape: bf16[2,8,32], index: 4, kind: output, shape index: {}]  }
   0x1   :  { %s1319_s17 = smov 0  }
   0x2 LB: > { %s33_s18 = sadd.s32 1, %s1274_s16  ;;  %p1098_p0 = scmp.ge.s32.totalorder %s1278_s17, 1  ;;  %s1278_s17 = sphi %s1319_s17, %s14_s17   ;;  %s1274_s16 = sphi %s1317_s16, %s1527_s16   ;;  %s1270_s15 = sphi %s1315_s15, %s1526_s15  }
   0x3   : > { %p35_p1 = scmp.ge.s32.totalorder %s33_s18, 2  ;;  %p228_p2 = scmp.lt.s32.totalorder %s1278_s17, 3 }
   0x5   : > { %s1529_s18 = smov (%p35_p1, %s33_s18), 0  ;;  %p229_p3 = pnand %p1098_p0, %p228_p2 }
   0x6   : > { %p278_p4 = scmp.lt.s32.totalorder (!%p229_p3), %s1270_s15, 1  ;;  %s1284_s29 = smov (!%p229_p3), 120  }
   0x7   : > { %232 = sbr.rel (%p229_p3) target bundleno = 1382 (0x566), region = 36  ;;  %s1285_s30 = smov (!%p229_p3), 112  }
   0x8   : > { %s1286_s5 = smov (!%p229_p3), 104   ;;  %s1287_s9 = smov (!%p229_p3), 8  }
   0x9   : > { %s1288_s10 = smov (!%p229_p3), 16   ;;  %s1289_s11 = smov (!%p229_p3), 24  }
   0xc   : > { %v1280_v0 = vmov 0.0   ;;  %vm1281_vm0 = vmmov 0   ;;  %s1531_s15 = smov (!%p278_p4, %s1270_s15), 1  ;;  %vm332_vm1 = vcmask 64512   ;;  %vm317_vm2 = vcmask 7168  }
   0xd   : > { %1139 = vmatprep.subr.bf16.mxu0 %v1280_v0  ;;  %1141 = vmatprep.mubr.msk.bf16.mxu0 %vm1281_vm0, %v1280_v0  ;;  %s1339_s19 = sshll.u32 %s1531_s15, 2  ;;  %v1282_v4 = vmov -1e+09   ;;  %322 = vst.msk [vmem:[#allocation3] sm:$0xff] %vm317_vm2, %v1280_v0  ;;  %323 = vst.msk [vmem:[#allocation3 + $0x8] sm:$0xff] %vm317_vm2, %v1280_v0  ;;  %s283_s28 = scalar_lea.vmem %s1521_s0, %s1531_s15  ;;  %v1283_v13 = vmov 0  }
   0xe   : > { %1145 = vmatprep.subr.bf16.mxu1 %v1280_v0  ;;  %1147 = vmatprep.mubr.msk.bf16.mxu1 %vm1281_vm0, %v1280_v0  ;;  %s1345_s22 = scalar_lea.vmem %s1523_s2, %s1339_s19  ;;  %s1352_s25 = scalar_lea.vmem %s1522_s1, %s1339_s19  ;;  %318 = vst.msk [vmem:[#allocation2] sm:$0xff] %vm317_vm2, %v1282_v4  ;;  %319 = vst.msk [vmem:[#allocation2 + $0x8] sm:$0xff] %vm317_vm2, %v1282_v4  ;;  %v1375_v6 = vld [vmem:[%s283_s28] ss:$0 sm:$0xff]  ;;  %vm422_vm3 = vcmask 1043456   ;;  %vm326_vm4 = vcmask 261120  }
   0xf   : > { %v330_v1 = vld [vmem:[%s1345_s22] sm:$0xf]  ;;  %320 = vst.msk [vmem:[#allocation2 + $0x10] sm:$0xff] %vm317_vm2, %v1282_v4  ;;  %321 = vst.msk [vmem:[#allocation2 + $0x18] sm:$0xff] %vm317_vm2, %v1282_v4  ;;  %1221 = vset.pattern.permute.xlu0 %v1283_v13  ;;  %1222 = vset.pattern.permute.xlu1 %v1283_v13  ;;  %s1405_s8 = scalar_lea.vmem %s1524_s3, %s1339_s19  ;;  %vm619_vm5 = vcmask 130112   ;;  %vm772_vm6 = vcmask 195712   ;;  %s311_s14 = scalar_lea.vmem %s1525_s4, %s1339_s19 }
  0x10   : > { %v337_v2 = vsel %vm332_vm1, %v330_v1, 0  ;;  %v329_v3 = vld [vmem:[%s1352_s25] sm:$0xf]  ;;  %324 = vst.msk [vmem:[#allocation3 + $0x10] sm:$0xff] %vm317_vm2, %v1280_v0  ;;  %325 = vst.msk [vmem:[#allocation3 + $0x18] sm:$0xff] %vm317_vm2, %v1280_v0  ;;  %vm925_vm7 = vcmask 261312  }
  0x11   : > { %1140 = vmatpush3.bf16.xpose.msra.mxu0 %v337_v2  ;;  %v1223_v14 = vld [vmem:[%s1345_s22] ss:$0 sps:$4 sm:$0xff]   ;;  %327 = vst.msk [vmem:[#allocation4] sm:$0xff] %vm326_vm4, %v1280_v0  ;;  %vm973_vm8 = vcmask 257024  }
  0x12   : > { %1157 = vmatprep.subr.bf16.mxu0 %v1280_v0  ;;  %480 = vrot.lane.b32.xlu1 %v1223_v14, %s1284_s29  ;;  %v1224_v15 = vld [vmem:[%s1352_s25] ss:$0 sps:$4 sm:$0xff]  }
  0x13   : > { %v1225_v16 = vld [vmem:[%s1345_s22] ss:$0 sps:$4 sm:$0xff]  }
  0x14   : > { %v1226_v17 = vld [vmem:[%s1352_s25] ss:$0 sps:$4 sm:$0xff]  }
  0x15   : > { %v1227_v18 = vld [vmem:[%s1345_s22] ss:$0 sps:$4 sm:$0xff]  }
  0x16   : > { %475 = vrot.lane.b32.xlu1 %v1224_v15, %s1284_s29  ;;  %v1228_v19 = vld [vmem:[%s1352_s25] ss:$0 sps:$4 sm:$0xff]  }
  0x17   : > { %v1391_v20 = vld [vmem:[#allocation2] sm:$0xff] }
  0x18   : > { %1142 = vmatmul.mubr.msk.bf16.vlgmr.msra.gmra.mxu0 %vm332_vm1, %v329_v3  ;;  %v331_v24 = vld [vmem:[%s1405_s8] sm:$0xf]  ;;  %v531_v3 = vld [vmem:[#allocation2 + $0x8] sm:$0xff] }
  0x19   : > { %1159 = vmatprep.mubr.msk.bf16.mxu0 %vm1281_vm0, %v1280_v0  ;;  %v424_v25 = vsel %vm422_vm3, %v331_v24, 0  ;;  %v1230_v15 = vld [vmem:[%s1405_s8] ss:$0 sps:$4 sm:$0xff]  }
  0x1a   : > { %633 = vrot.lane.b32.xlu1 %v1225_v16, %s1285_s30  ;;  %1146 = vmatpush3.bf16.msra.mxu1 %v424_v25  ;;  %v1231_v16 = vld [vmem:[%s1405_s8] ss:$0 sps:$4 sm:$0xff]  }
  0x1b   : > { %1151 = vmatprep.subr.bf16.mxu1 %v1280_v0 }
  0x1e   : > { %628 = vrot.lane.b32.xlu1 %v1226_v17, %s1285_s30 }
  0x22   : > { %786 = vrot.lane.b32.xlu1 %v1227_v18, %s1286_s5 }
  0x26   : > { %781 = vrot.lane.b32.xlu1 %v1228_v19, %s1286_s5 }
  0x84   : > { %v481_v29 = vpop.permute.xlu1 %480 }
  0x85   : > { %v486_v32 = vsel %vm332_vm1, %v481_v29, 0 }
  0x88   : > { %v476_v30 = vpop.permute.xlu1 %475 }
  0x8c   : > { %v634_v34 = vpop.permute.xlu1 %633 }
  0x8d   : > { %v639_v36 = vsel %vm332_vm1, %v634_v34, 0 }
  0x90   : > { %v629_v35 = vpop.permute.xlu1 %628 }
  0x94   : > { %v787_v37 = vpop.permute.xlu1 %786 }
  0x95   : > { %v792_v38 = vsel %vm332_vm1, %v787_v37, 0 }
  0x98   : > { %v782_v39 = vpop.permute.xlu1 %781 }
  0xd8   : > { %v373_v5 = vpop.f32.mrf.mxu0 }
  0xd9   : > { %v379_v7 = vmul.f32 0.35355338, %v373_v5 }
  0xda   : > { %v1143_v8 = vpop.f32.mrf.mxu0 }
  0xdb   : > { %v386_v9 = vadd.f32 %v1375_v6, %v379_v7  ;;  %v684_v7 = vld [vmem:[#allocation2 + $0x10] sm:$0xff] }
  0xdc   : > { %v376_v10 = vpop.f32.mrf.mxu0 }
  0xdd   : > { %v388_v11 = vsel %vm332_vm1, %v386_v9, -inf }
  0xde   : > { %v1144_v12 = vpop.f32.mrf.mxu0  ;;  %389 = vmax.xlane.f32.xlu0 %v388_v11  ;;  %v1456_v11 = vld [vmem:[#allocation2 + $0x18] sm:$0xff] }
 0x167   : > { %v390_v21 = vpop.xlane.xlu0 %389 }
 0x168   : > { %v1394_v22 = vmax.f32 %v1391_v20, %v390_v21 }
 0x16a   : > { %v392_v23 = vsub.f32 %v1391_v20, %v1394_v22  ;;  %468 = vst.msk [vmem:[#allocation2] sm:$0xff] %vm317_vm2, %v1394_v22  ;;  %397 = vperm.xlu0 %1221, %v1394_v22  }
 0x16c   : > { %v393_v2 = vmul.f32 1.442695, %v392_v23 }
 0x1e5   : > { %v398_v26 = vpop.permute.xlu0 %397 }
 0x1e6   : > { %v400_v27 = vsub.f32 %v386_v9, %v398_v26 }
 0x1e8   : > { %v401_v28 = vmul.f32 1.442695, %v400_v27 }
 0x1ea   : > { %1232 = vpow2.f32 %v401_v28 }
 0x1eb   : > { %1234 = vpow2.f32 %v393_v2  ;;  %v854_v2 = vld [vmem:[#allocation3 + $0x18] sm:$0xff] }
 0x1f7   : > { %v1410_v31 = vpop.eup %1232 }
 0x1f8   : > { %v418_v33 = vpack.c.bf16 %v1410_v31, %v1410_v31  ;;  %v1454_v10 = vpop.eup %1234  ;;  %v405_v20 = vsel %vm332_vm1, %v1410_v31, 0.0  ;;  %v411_v31 = vld [vmem:[#allocation4] sm:$0xff] }
 0x1fa   : > { %1148 = vmatmul.mubr.msk.bf16.vlgmr.msra.gmra.mxu1 %vm332_vm1, %v418_v33 }
 0x1fb   : > { %1152 = vmatpush3.bf16.xpose.msra.mxu1 %v486_v32  ;;  %1153 = vmatprep.mubr.msk.bf16.mxu1 %vm1281_vm0, %v1280_v0 }
 0x1fc   : > { %1163 = vmatprep.subr.bf16.mxu1 %v1280_v0 }
 0x202   : > { %1154 = vmatmul.mubr.msk.bf16.vlgmr.msra.gmra.mxu1 %vm332_vm1, %v476_v30 }
 0x203   : > { %1164 = vmatpush3.bf16.xpose.msra.mxu1 %v639_v36  ;;  %1165 = vmatprep.mubr.msk.bf16.mxu1 %vm1281_vm0, %v1280_v0 }
 0x204   : > { %1175 = vmatprep.subr.bf16.mxu1 %v1280_v0 }
 0x20a   : > { %1166 = vmatmul.mubr.msk.bf16.vlgmr.msra.gmra.mxu1 %vm332_vm1, %v629_v35 }
 0x20b   : > { %1176 = vmatpush3.bf16.xpose.msra.mxu1 %v792_v38  ;;  %1177 = vmatprep.mubr.msk.bf16.mxu1 %vm1281_vm0, %v1280_v0 }
 0x212   : > { %1178 = vmatmul.mubr.msk.bf16.vlgmr.msra.gmra.mxu1 %vm332_vm1, %v782_v39 }
 0x2ba   : > { %v1429_v40 = vpop.f32.mrf.mxu1 }
 0x2bc   : > { %v1149_v41 = vpop.f32.mrf.mxu1 }
 0x2be   : > { %v463_v42 = vpop.f32.mrf.mxu1 }
 0x2c0   : > { %v1150_v43 = vpop.f32.mrf.mxu1 }
 0x2c2   : > { %v522_v44 = vpop.f32.mrf.mxu1 }
 0x2c3   : > { %v528_v45 = vmul.f32 0.35355338, %v522_v44 }
 0x2c4   : > { %v1155_v46 = vpop.f32.mrf.mxu1 }
 0x2c5   : > { %v1432_v47 = vadd.f32 %v1375_v6, %v528_v45 }
 0x2c6   : > { %v525_v48 = vpop.f32.mrf.mxu1 }
 0x2c7   : > { %v532_v49 = vsel %vm332_vm1, %v1432_v47, -inf }
 0x2c8   : > { %533 = vmax.xlane.f32.xlu1 %v532_v49  ;;  %v1156_v50 = vpop.f32.mrf.mxu1 }
 0x2ca   : > { %v675_v51 = vpop.f32.mrf.mxu1 }
 0x2cb   : > { %v681_v52 = vmul.f32 0.35355338, %v675_v51 }
 0x2cc   : > { %v1167_v53 = vpop.f32.mrf.mxu1 }
 0x2cd   : > { %v1437_v54 = vadd.f32 %v1375_v6, %v681_v52  ;;  %v403_v52 = vld [vmem:[#allocation3] sm:$0xff] }
 0x2ce   : > { %v678_v55 = vpop.f32.mrf.mxu1  ;;  %v404_v53 = vmul.f32 %v1454_v10, %v403_v52 }
 0x2cf   : > { %v685_v56 = vsel %vm332_vm1, %v1437_v54, -inf }
 0x2d0   : > { %686 = vmax.xlane.f32.xlu0 %v685_v56  ;;  %v1168_v57 = vpop.f32.mrf.mxu1 }
 0x2d1   : > { %v548_v57 = vld [vmem:[#allocation3 + $0x8] sm:$0xff] }
 0x2d2   : > { %v828_v58 = vpop.f32.mrf.mxu1 }
 0x2d3   : > { %v834_v59 = vmul.f32 0.35355338, %v828_v58 }
 0x2d4   : > { %v1179_v60 = vpop.f32.mrf.mxu1 }
 0x2d5   : > { %v1442_v61 = vadd.f32 %v1375_v6, %v834_v59  ;;  %v1229_v6 = vld [vmem:[%s1405_s8] ss:$0 sps:$4 sm:$0xff]   ;;  %v701_v60 = vld [vmem:[#allocation3 + $0x10] sm:$0xff] }
 0x2d6   : > { %v831_v62 = vpop.f32.mrf.mxu1 }
 0x2d7   : > { %v838_v63 = vsel %vm332_vm1, %v1442_v61, -inf }
 0x2d8   : > { %839 = vmax.xlane.f32.xlu1 %v838_v63  ;;  %v1180_v1 = vpop.f32.mrf.mxu1 }
 0x351   : > { %v534_v4 = vpop.xlane.xlu1 %533 }
 0x352   : > { %v535_v5 = vmax.f32 %v531_v3, %v534_v4 }
 0x354   : > { %621 = vst.msk [vmem:[#allocation2 + $0x8] sm:$0xff] %vm317_vm2, %v535_v5  ;;  %541 = vperm.xlu1 %1222, %v535_v5   ;;  %v536_v17 = vsub.f32 %v531_v3, %v535_v5 }
 0x356   : > { %v537_v18 = vmul.f32 1.442695, %v536_v17 }
 0x358   : > { %566 = vrot.lane.b32.xlu1 %v1229_v6, %s1284_s29  ;;  %1236 = vpow2.f32 %v537_v18 }
 0x359   : > { %v687_v8 = vpop.xlane.xlu0 %686 }
 0x35a   : > { %v688_v9 = vmax.f32 %v684_v7, %v687_v8 }
 0x35c   : > { %774 = vst.msk [vmem:[#allocation2 + $0x10] sm:$0xff] %vm317_vm2, %v688_v9  ;;  %694 = vperm.xlu0 %1221, %v688_v9   ;;  %v689_v19 = vsub.f32 %v684_v7, %v688_v9 }
 0x35e   : > { %v690_v21 = vmul.f32 1.442695, %v689_v19 }
 0x360   : > { %414 = vperm.xlu0 %1221, %v1454_v10   ;;  %1238 = vpow2.f32 %v690_v21 }
 0x361   : > { %v840_v12 = vpop.xlane.xlu1 %839 }
 0x362   : > { %v1460_v13 = vmax.f32 %v1456_v11, %v840_v12 }
 0x364   : > { %v842_v14 = vsub.f32 %v1456_v11, %v1460_v13  ;;  %927 = vst.msk [vmem:[#allocation2 + $0x18] sm:$0xff] %vm317_vm2, %v1460_v13  ;;  %847 = vperm.xlu1 %1222, %v1460_v13  }
 0x365   : > { %v1237_v22 = vpop.eup %1236 }
 0x366   : > { %v843_v56 = vmul.f32 1.442695, %v842_v14 }
 0x368   : > { %719 = vrot.lane.b32.xlu1 %v1230_v15, %s1285_s30 }
 0x36c   : > { %872 = vrot.lane.b32.xlu1 %v1231_v16, %s1286_s5 }
 0x36d   : > { %v1239_v23 = vpop.eup %1238 }
 0x390   : > { %406 = vadd.xlane.f32.xlu1 %v405_v20 }
 0x3a1   : > { %558 = vperm.xlu1 %1222, %v1237_v22  }
 0x3a5   : > { %711 = vperm.xlu1 %1222, %v1239_v23  }
 0x3cf   : > { %v542_v24 = vpop.permute.xlu1 %541 }
 0x3d0   : > { %v544_v25 = vsub.f32 %v1432_v47, %v542_v24 }
 0x3d2   : > { %v545_v26 = vmul.f32 1.442695, %v544_v25 }
 0x3d3   : > { %v567_v27 = vpop.permute.xlu1 %566 }
 0x3d4   : > { %1240 = vpow2.f32 %v545_v26  ;;  %v572_v28 = vsel %vm422_vm3, %v567_v27, 0 }
 0x3d5   : > { %1158 = vmatpush3.bf16.msra.mxu0 %v572_v28 }
 0x3d6   : > { %1169 = vmatprep.subr.bf16.mxu0 %v1280_v0 }
 0x3d7   : > { %v695_v29 = vpop.permute.xlu0 %694 }
 0x3d8   : > { %v697_v30 = vsub.f32 %v1437_v54, %v695_v29 }
 0x3da   : > { %v698_v32 = vmul.f32 1.442695, %v697_v30 }
 0x3db   : > { %v415_v33 = vpop.permute.xlu0 %414 }
 0x3dc   : > { %1242 = vpow2.f32 %v698_v32  ;;  %v417_v34 = vmul.f32 %v415_v33, %v411_v31 }
 0x3de   : > { %v466_v35 = vadd.f32 %v1429_v40, %v417_v34 }
 0x3df   : > { %v848_v36 = vpop.permute.xlu1 %847 }
 0x3e0   : > { %467 = vst.msk [vmem:[#allocation4] sm:$0xff] %vm332_vm1, %v466_v35  ;;  %v850_v37 = vsub.f32 %v1442_v61, %v848_v36  ;;  %v702_v61 = vmul.f32 %v1239_v23, %v701_v60 }
 0x3e1   : > { %v1241_v38 = vpop.eup %1240 }
 0x3e2   : > { %v851_v39 = vmul.f32 1.442695, %v850_v37  ;;  %v550_v41 = vsel %vm332_vm1, %v1241_v38, 0.0  ;;  %v562_v42 = vpack.c.bf16 %v1241_v38, %v1241_v38 }
 0x3e3   : > { %v720_v43 = vpop.permute.xlu1 %719  ;;  %551 = vadd.xlane.f32.xlu0 %v550_v41 }
 0x3e4   : > { %1244 = vpow2.f32 %v851_v39  ;;  %v725_v44 = vsel %vm422_vm3, %v720_v43, 0  ;;  %1160 = vmatmul.mubr.msk.bf16.vlgmr.msra.gmra.mxu0 %vm332_vm1, %v562_v42 }
 0x3e5   : > { %1170 = vmatpush3.bf16.msra.mxu0 %v725_v44  ;;  %1171 = vmatprep.mubr.msk.bf16.mxu0 %vm1281_vm0, %v1280_v0  ;;  %1246 = vpow2.f32 %v843_v56 }
 0x3e6   : > { %1181 = vmatprep.subr.bf16.mxu0 %v1280_v0 }
 0x3e7   : > { %v873_v40 = vpop.permute.xlu1 %872  ;;  %v555_v27 = vld [vmem:[#allocation4] sm:$0xff] }
 0x3e8   : > { %v878_v48 = vsel %vm422_vm3, %v873_v40, 0 }
 0x3e9   : > { %v1243_v45 = vpop.eup %1242 }
 0x3ea   : > { %v703_v46 = vsel %vm332_vm1, %v1243_v45, 0.0  ;;  %v715_v47 = vpack.c.bf16 %v1243_v45, %v1243_v45 }
 0x3eb   : > { %704 = vadd.xlane.f32.xlu0 %v703_v46 }
 0x3ec   : > { %1172 = vmatmul.mubr.msk.bf16.vlgmr.msra.gmra.mxu0 %vm332_vm1, %v715_v47 }
 0x3ed   : > { %1182 = vmatpush3.bf16.msra.mxu0 %v878_v48  ;;  %1183 = vmatprep.mubr.msk.bf16.mxu0 %vm1281_vm0, %v1280_v0  ;;  %v549_v0 = vmul.f32 %v1237_v22, %v548_v57 }
 0x3f1   : > { %v1245_v49 = vpop.eup %1244 }
 0x3f2   : > { %v856_v50 = vsel %vm332_vm1, %v1245_v49, 0.0  ;;  %v868_v51 = vpack.c.bf16 %v1245_v49, %v1245_v49  ;;  %v1247_v1 = vpop.eup %1246 }
 0x3f3   : > { %857 = vadd.xlane.f32.xlu0 %v856_v50  ;;  %v855_v3 = vmul.f32 %v1247_v1, %v854_v2 }
 0x3f4   : > { %1184 = vmatmul.mubr.msk.bf16.vlgmr.msra.gmra.mxu0 %vm332_vm1, %v868_v51 }
 0x419   : > { %v407_v54 = vpop.xlane.xlu1 %406 }
 0x41a   : > { %v408_v55 = vadd.f32 %v407_v54, %v404_v53 }
 0x41c   : > { %410 = vst.msk [vmem:[#allocation3] sm:$0xff] %vm317_vm2, %v408_v55 }
 0x41d   : > { %v559_v26 = vpop.permute.xlu1 %558 }
 0x41e   : > { %v561_v28 = vmul.f32 %v559_v26, %v555_v27 }
 0x421   : > { %v712_v31 = vpop.permute.xlu1 %711 }
 0x423   : > { %v932_v6 = vld [vmem:[#allocation3] sm:$0xff] }
 0x424   : > { %1248 = vrcp.f32 %v932_v6 }
 0x431   : > { %v1249_v10 = vpop.eup %1248 }
 0x46c   : > { %v552_v58 = vpop.xlane.xlu0 %551 }
 0x46d   : > { %v553_v59 = vadd.f32 %v552_v58, %v549_v0 }
 0x46f   : > { %554 = vst.msk [vmem:[#allocation3 + $0x8] sm:$0xff] %vm317_vm2, %v553_v59 }
 0x474   : > { %v705_v62 = vpop.xlane.xlu0 %704 }
 0x475   : > { %v706_v63 = vadd.f32 %v705_v62, %v702_v61 }
 0x476   : > { %v942_v12 = vld [vmem:[#allocation3 + $0x8] sm:$0xff] }
 0x477   : > { %707 = vst.msk [vmem:[#allocation3 + $0x10] sm:$0xff] %vm317_vm2, %v706_v63 }
 0x47c   : > { %v858_v4 = vpop.xlane.xlu0 %857 }
 0x47d   : > { %v859_v5 = vadd.f32 %v858_v4, %v855_v3 }
 0x47e   : > { %v952_v7 = vld [vmem:[#allocation3 + $0x10] sm:$0xff] }
 0x47f   : > { %860 = vst.msk [vmem:[#allocation3 + $0x18] sm:$0xff] %vm317_vm2, %v859_v5  ;;  %1250 = vrcp.f32 %v952_v7 }
 0x480   : > { %1252 = vrcp.f32 %v942_v12 }
 0x486   : > { %v962_v16 = vld [vmem:[#allocation3 + $0x18] sm:$0xff] }
 0x487   : > { %1254 = vrcp.f32 %v962_v16 }
 0x48c   : > { %v1251_v14 = vpop.eup %1250 }
 0x48d   : > { %v1253_v22 = vpop.eup %1252 }
 0x494   : > { %v1255_v25 = vpop.eup %1254 }
 0x4a4   : > { %v608_v8 = vpop.f32.mrf.mxu0 }
 0x4a5   : > { %615 = vrot.lane.b32.xlu0 %v608_v8, %s1287_s9 }
 0x4a6   : > { %v1161_v9 = vpop.f32.mrf.mxu0 }
 0x4a8   : > { %v611_v11 = vpop.f32.mrf.mxu0 }
 0x4a9   : > { %936 = vperm.xlu0 %1221, %v1249_v10  }
 0x4aa   : > { %v1162_v13 = vpop.f32.mrf.mxu0 }
 0x4ac   : > { %v761_v15 = vpop.f32.mrf.mxu0 }
 0x4ad   : > { %768 = vrot.lane.b32.xlu1 %v761_v15, %s1288_s10  ;;  %956 = vperm.xlu0 %1221, %v1251_v14  }
 0x4ae   : > { %v1173_v17 = vpop.f32.mrf.mxu0 }
 0x4b0   : > { %v764_v18 = vpop.f32.mrf.mxu0 }
 0x4b1   : > { %864 = vperm.xlu1 %1222, %v1247_v1  }
 0x4b2   : > { %v1174_v19 = vpop.f32.mrf.mxu0 }
 0x4b4   : > { %v914_v20 = vpop.f32.mrf.mxu0 }
 0x4b5   : > { %921 = vrot.lane.b32.xlu1 %v914_v20, %s1289_s11 }
 0x4b6   : > { %v1185_v21 = vpop.f32.mrf.mxu0 }
 0x4b8   : > { %v917_v23 = vpop.f32.mrf.mxu0 }
 0x4b9   : > { %946 = vperm.xlu1 %1222, %v1253_v22  }
 0x4ba   : > { %v1186_v24 = vpop.f32.mrf.mxu0 }
 0x4bd   : > { %966 = vperm.xlu1 %1222, %v1255_v25  }
 0x517   : > { %v616_v29 = vpop.permute.xlu0 %615 }
 0x518   : > { %v618_v30 = vadd.f32 %v616_v29, %v561_v28 }
 0x51a   : > { %620 = vst.msk [vmem:[#allocation4] sm:$0xff] %vm619_vm5, %v618_v30 }
 0x51f   : > { %v769_v34 = vpop.permute.xlu1 %768 }
 0x521   : > { %v708_v32 = vld [vmem:[#allocation4] sm:$0xff] }
 0x522   : > { %v714_v33 = vmul.f32 %v712_v31, %v708_v32 }
 0x524   : > { %v771_v35 = vadd.f32 %v769_v34, %v714_v33  ;;  %v937_v42 = vpop.permute.xlu0 %936 }
 0x526   : > { %773 = vst.msk [vmem:[#allocation4] sm:$0xff] %vm772_vm6, %v771_v35 }
 0x528   : > { %v957_v47 = vpop.permute.xlu0 %956 }
 0x52c   : > { %v865_v36 = vpop.permute.xlu1 %864 }
 0x52d   : > { %v861_v37 = vld [vmem:[#allocation4] sm:$0xff] }
 0x52e   : > { %v867_v38 = vmul.f32 %v865_v36, %v861_v37 }
 0x530   : > { %v922_v39 = vpop.permute.xlu1 %921 }
 0x531   : > { %v924_v41 = vadd.f32 %v922_v39, %v867_v38 }
 0x533   : > { %926 = vst.msk [vmem:[#allocation4] sm:$0xff] %vm925_vm7, %v924_v41 }
 0x534   : > { %v947_v40 = vpop.permute.xlu1 %946 }
 0x538   : > { %v967_v50 = vpop.permute.xlu1 %966 }
 0x53a   : > { %v931_v43 = vld [vmem:[#allocation4] sm:$0xff] }
 0x53b   : > { %v939_v44 = vmul.f32 %v937_v42, %v931_v43 }
 0x53d   : > { %940 = vst.msk [vmem:[#allocation4] sm:$0xff] %vm332_vm1, %v939_v44 }
 0x544   : > { %v941_v45 = vld [vmem:[#allocation4] sm:$0xff] }
 0x545   : > { %v949_v46 = vmul.f32 %v947_v40, %v941_v45 }
 0x547   : > { %950 = vst.msk [vmem:[#allocation4] sm:$0xff] %vm619_vm5, %v949_v46 }
 0x54e   : > { %v951_v48 = vld [vmem:[#allocation4] sm:$0xff] }
 0x54f   : > { %v959_v49 = vmul.f32 %v957_v47, %v951_v48 }
 0x551   : > { %960 = vst.msk [vmem:[#allocation4] sm:$0xff] %vm772_vm6, %v959_v49 }
 0x558   : > { %v961_v51 = vld [vmem:[#allocation4] sm:$0xff] }
 0x559   : > { %v969_v52 = vmul.f32 %v967_v50, %v961_v51 }
 0x55b   : > { %970 = vst.msk [vmem:[#allocation4] sm:$0xff] %vm925_vm7, %v969_v52 }
 0x562   : > { %v971_v53 = vld [vmem:[#allocation4] sm:$0xff] }
 0x563   : > { %v972_v54 = vpack.c.bf16 %v971_v53, %v971_v53 }
 0x565   : > { %974 = vst.msk [vmem:[%s311_s14] sm:$0xf] %vm973_vm8, %v972_v54 }
 0x566 PF: > { %s14_s17 = sadd.s32 1, %s1278_s17   ;;  %s1526_s15 = smov %s1274_s16 }
 0x567   : > { %p11_p5 = scmp.ge.s32.totalorder %s14_s17, 4   ;;  %s1527_s16 = smov %s1529_s18 }
 0x569   :  { %13 = sbr.rel (!%p11_p5) target bundleno = 2 (0x2), region = 89 }

// kernel: _lambda_.15
= control target key start
LH: loop header
LB: loop body
LE: loop exit
PB: predicated region body
PF: predicated region fallthrough
CT: control target
= control target key end

     0   :  { %vm19_vm0 = vcmask 261120   ;;  %v225_v0 = vmov 0.0   ;;  %vm226_vm1 = vmmov 0   ;;  %vm164_vm2 = vcmask 257024   ;;  %s287_s1 = inlined_call_operand.vmem [shape: bf16[128,32], index: 1, kind: input, shape index: {}]   ;;  %s288_s0 = inlined_call_operand.vmem [shape: bf16[16,128], index: 0, kind: input, shape index: {}]   ;;  %s289_s2 = inlined_call_operand.vmem [shape: f32[1,32], index: 2, kind: input, shape index: {}]   ;;  %s290_s3 = inlined_call_operand.vmem [shape: bf16[16,32], index: 3, kind: output, shape index: {}]  }
   0x1   :  { %194 = vmatprep.subr.bf16.mxu0 %v225_v0  ;;  %v216_v1 = vld [vmem:[%s287_s1 + $0x38] sm:$0xff]   ;;  %210 = vmatprep.mubr.msk.bf16.mxu0 %vm226_vm1, %v225_v0  ;;  %20 = vst.msk [vmem:[#allocation2] sm:$0xff] %vm19_vm0, %v225_v0  ;;  %21 = vst.msk [vmem:[#allocation2 + $0x8] sm:$0xff] %vm19_vm0, %v225_v0  ;;  %v217_v2 = vld [vmem:[%s287_s1 + $0x30] sm:$0xff]  }
   0x2   :  { %195 = vmatpush3.bf16.msra.mxu0 %v216_v1  ;;  %v218_v3 = vld [vmem:[%s287_s1 + $0x28] sm:$0xff]   ;;  %v219_v4 = vld [vmem:[%s287_s1 + $0x20] sm:$0xff]   ;;  %v220_v5 = vld [vmem:[%s287_s1 + $0x18] sm:$0xff]  }
   0x3   :  { %196 = vmatprep.subr.bf16.mxu0 %v225_v0  ;;  %v221_v6 = vld [vmem:[%s287_s1 + $0x10] sm:$0xff]   ;;  %v222_v7 = vld [vmem:[%s287_s1 + $0x8] sm:$0xff]   ;;  %v223_v8 = vld [vmem:[%s287_s1] sm:$0xff]  }
   0x4   :  { %v224_v9 = vld [vmem:[%s288_s0] sm:$0xff]  }
   0x5   :  { %v180_v18 = vld [vmem:[%s289_s2] ss:$0 sm:$0xff] }
   0x6   :  { %197 = vmatpush3.bf16.msra.mxu0 %v217_v2 }
   0x7   :  { %198 = vmatprep.subr.bf16.mxu0 %v225_v0 }
   0x8   :  { %v22_v10 = vld [vmem:[#allocation2] sm:$0xff]  ;;  %v23_v14 = vld [vmem:[#allocation2 + $0x8] sm:$0xff] }
   0xa   :  { %199 = vmatpush3.bf16.msra.mxu0 %v218_v3 }
   0xb   :  { %200 = vmatprep.subr.bf16.mxu0 %v225_v0 }
   0xe   :  { %201 = vmatpush3.bf16.msra.mxu0 %v219_v4 }
   0xf   :  { %202 = vmatprep.subr.bf16.mxu0 %v225_v0 }
  0x12   :  { %203 = vmatpush3.bf16.msra.mxu0 %v220_v5 }
  0x13   :  { %204 = vmatprep.subr.bf16.mxu0 %v225_v0 }
  0x16   :  { %205 = vmatpush3.bf16.msra.mxu0 %v221_v6 }
  0x17   :  { %206 = vmatprep.subr.bf16.mxu0 %v225_v0 }
  0x1a   :  { %207 = vmatpush3.bf16.msra.mxu0 %v222_v7 }
  0x1b   :  { %208 = vmatprep.subr.bf16.mxu0 %v225_v0 }
  0x1e   :  { %209 = vmatpush3.bf16.msra.mxu0 %v223_v8 }
  0x21   :  { %211 = vmatmul.mubr.bf16.vlgmr.msra.gmra.mxu0 %v224_v9 }
  0xe1   :  { %v130_v11 = vpop.f32.mrf.mxu0 }
  0xe2   :  { %v137_v12 = vadd.f32 %v130_v11, %v22_v10 }
  0xe3   :  { %v212_v13 = vpop.f32.mrf.mxu0 }
  0xe4   :  { %140 = vst.msk [vmem:[#allocation2] sm:$0xff] %vm19_vm0, %v137_v12 }
  0xe5   :  { %v133_v15 = vpop.f32.mrf.mxu0 }
  0xe6   :  { %v138_v16 = vadd.f32 %v133_v15, %v23_v14 }
  0xe7   :  { %v213_v17 = vpop.f32.mrf.mxu0 }
  0xe8   :  { %141 = vst.msk [vmem:[#allocation2 + $0x8] sm:$0xff] %vm19_vm0, %v138_v16 }
  0xeb   :  { %v145_v19 = vld [vmem:[#allocation2] sm:$0xff] }
  0xec   :  { %v154_v20 = vadd.f32 %v180_v18, %v145_v19 }
  0xee   :  { %v183_v21 = vpack.c.bf16 %v154_v20, %v154_v20 }
  0xef   :  { %v146_v22 = vld [vmem:[#allocation2 + $0x8] sm:$0xff] }
  0xf0   :  { %165 = vst.msk [vmem:[%s290_s3] sm:$0xf] %vm164_vm2, %v183_v21  ;;  %v155_v23 = vadd.f32 %v180_v18, %v146_v22 }
  0xf2   :  { %v184_v24 = vpack.c.bf16 %v155_v23, %v155_v23 }
  0xf4   :  { %166 = vst.msk [vmem:[%s290_s3 + $0x4] sm:$0xf] %vm164_vm2, %v184_v24 }

// kernel: _lambda_.21
= control target key start
LH: loop header
LB: loop body
LE: loop exit
PB: predicated region body
PF: predicated region fallthrough
CT: control target
= control target key end

     0   :  { %vm34_vm0 = vcmask 130048   ;;  %v116_v0 = vmov 0.0   ;;  %vm117_vm1 = vmmov 0   ;;  %vm87_vm2 = vcmask 386048   ;;  %s152_s1 = inlined_call_operand.vmem [shape: bf16[48,16], index: 1, kind: input, shape index: {}]   ;;  %s153_s0 = inlined_call_operand.vmem [shape: bf16[2,16], index: 0, kind: input, shape index: {}]   ;;  %s154_s2 = inlined_call_operand.vmem [shape: f32[2,48], index: 2, kind: output, shape index: {}]  }
   0x1   :  { %101 = vmatprep.subr.bf16.mxu0 %v116_v0  ;;  %v113_v1 = vld [vmem:[%s152_s1 + $0x10] sm:$0xff]   ;;  %107 = vmatprep.mubr.msk.bf16.mxu0 %vm117_vm1, %v116_v0  ;;  %v114_v3 = vld [vmem:[%s152_s1 + $0x8] sm:$0xff]   ;;  %v115_v5 = vld [vmem:[%s152_s1] sm:$0xff]  }
   0x2   :  { %v45_v2 = vsel %vm34_vm0, %v113_v1, 0  ;;  %v42_v4 = vsel %vm34_vm0, %v114_v3, 0  ;;  %v39_v6 = vsel %vm34_vm0, %v115_v5, 0  ;;  %v12_v7 = vld [vmem:[%s153_s0] sm:$0x1] }
   0x3   :  { %102 = vmatpush3.bf16.xpose.msra.mxu0 %v45_v2 }
   0x4   :  { %103 = vmatprep.subr.bf16.mxu0 %v116_v0 }
   0xb   :  { %104 = vmatpush3.bf16.xpose.msra.mxu0 %v42_v4 }
   0xc   :  { %105 = vmatprep.subr.bf16.mxu0 %v116_v0 }
  0x13   :  { %106 = vmatpush3.bf16.xpose.msra.mxu0 %v39_v6 }
  0x1a   :  { %108 = vmatmul.mubr.msk.bf16.vlgmr.msra.gmra.mxu0 %vm34_vm0, %v12_v7 }
  0xda   :  { %v81_v8 = vpop.f32.mrf.mxu0 }
  0xdb   :  { %88 = vst.msk [vmem:[%s154_s2] sm:$0x3] %vm87_vm2, %v81_v8 }
  0xdc   :  { %v109_v9 = vpop.f32.mrf.mxu0 }
  0xde   :  { %v84_v10 = vpop.f32.mrf.mxu0 }
  0xe0   :  { %v110_v11 = vpop.f32.mrf.mxu0 }

</bundles_post_ra>
